<compile_context>
chip_gen: v6e
topology: v6e:2x2x1
jax: 0.10.0
libtpu: 0.0.40
codegen_flags: <defaults>
</compile_context>

<pallas_src>
import functools

import jax
import jax.numpy as jnp
import numpy as np
from jax import lax
from jax.experimental import pallas as pl
from jax.experimental.pallas import tpu as pltpu

_INV_SQRT2 = 0.7071067811865476
_SQRT_2_OVER_PI = 0.7978845608028654


def _round_up(x, m):
    return ((x + m - 1) // m) * m


def _residual_block_kernel(x_ref, w_ref, cb_ref, scale_ref, bias_ref,
                           o_ref, xpad_ref, *, H, W, K, RH, pad_l, approx_gelu):
    # x_ref    : (1, H, W, tc)       input block (residual is read from here too)
    # w_ref    : (K, K, tc)          depthwise conv weights
    # cb_ref   : (1, 1, tc)          conv bias
    # scale_ref/bias_ref : (1,1,tc)  folded BatchNorm (eval-mode) affine
    # o_ref    : (1, H, W, tc)       output block
    # xpad_ref : (H+2p, Wp, tc) f32  zero-bordered padded copy; interior starts at
    #                                (row=p, col=pad_l) with pad_l a multiple of 8.
    pad = K // 2
    Hp = H + 2 * pad
    Wp = xpad_ref.shape[1]
    tc = xpad_ref.shape[-1]
    dx0 = pad_l - pad            # scratch column of the leftmost conv tap

    # --- in-kernel "same" padding -------------------------------------------------
    # Scratch is uninitialized and persists per-core across grid steps, so the halo
    # border is (cheaply) re-zeroed every step: full-width top/bottom rows plus the
    # left/right column strips of the interior rows.
    if pad > 0:
        xpad_ref[0:pad, :, :] = jnp.zeros((pad, Wp, tc), jnp.float32)
        xpad_ref[pad + H:Hp, :, :] = jnp.zeros((pad, Wp, tc), jnp.float32)
        xpad_ref[pad:pad + H, 0:pad_l, :] = jnp.zeros((H, pad_l, tc), jnp.float32)
        xpad_ref[pad:pad + H, pad_l + W:Wp, :] = (
            jnp.zeros((H, Wp - pad_l - W, tc), jnp.float32))
    # Interior <- x (f32 accumulation precision).  Destination column pad_l is
    # sublane-aligned, so this lowers to unmasked full-tile stores.
    xpad_ref[pad:pad + H, pad_l:pad_l + W, :] = x_ref[0].astype(jnp.float32)

    # Per-channel parameters, hoisted out of the chunk loop.
    cb = cb_ref[0, 0, :]
    scale = scale_ref[0, 0, :]
    bias = bias_ref[0, 0, :]

    def do_chunk(h0):
        # Depthwise conv = K*K shifted multiply-accumulates on an RH-row chunk; the
        # chunk accumulator stays in vregs (no VMEM spill traffic).
        acc = jnp.zeros((RH, W, tc), jnp.float32)
        for dy in range(K):
            for dx in range(K):
                tap = xpad_ref[pl.ds(h0 + dy, RH), dx0 + dx:dx0 + dx + W, :]
                acc = acc + tap * w_ref[dy, dx, :]
        acc = acc + cb

        if approx_gelu:
            # tanh-approx GELU -> EUP slot (frees VALU); differs from torch default.
            inner = _SQRT_2_OVER_PI * (acc + 0.044715 * acc * acc * acc)
            g = 0.5 * acc * (1.0 + jnp.tanh(inner))
        else:
            # Exact GELU: matches torch.nn.GELU default (0.5*x*(1+erf(x/sqrt(2)))).
            g = 0.5 * acc * (1.0 + lax.erf(acc * _INV_SQRT2))

        # BatchNorm2d (eval) folded to scale/bias, then residual add.  The residual
        # is read from the aligned x block, not the offset scratch interior.
        res = x_ref[0, pl.ds(h0, RH), :, :].astype(jnp.float32)
        y = g * scale + bias + res
        o_ref[0, pl.ds(h0, RH), :, :] = y.astype(o_ref.dtype)

    n_chunks = H // RH
    if n_chunks == 1:
        do_chunk(0)
    else:
        def body(ci, carry):
            do_chunk(pl.multiple_of(ci * RH, RH))
            return carry
        lax.fori_loop(0, n_chunks, body, 0)


def _vmem_bytes(H, W, tc, K, itemsize):
    """Per-grid-step VMEM working-set estimate (double-buffered I/O + scratch)."""
    pad = K // 2
    pad_l = _round_up(pad, 8) if pad > 0 else 0
    Wp = _round_up(pad_l + W + pad, 8)
    io = 2 * 2 * H * W * tc * itemsize            # double-buffered in + out blocks
    params = 2 * (K * K + 3) * tc * 4             # weights + bias/scale/bias blocks
    scratch = (H + 2 * pad) * Wp * tc * 4         # padded f32 image
    return io + params + scratch


def _pick_tc(C, H, W, K, itemsize, budget_bytes=40 * 1024 * 1024):
    """Channel tile: full C if small, else the largest multiple of 128 dividing C
    whose per-step VMEM working set fits the budget (v7x: 64 MiB physical VMEM)."""
    if C <= 256:
        return C
    cands = [t for t in range(512, 127, -128) if C % t == 0]
    if not cands:
        return C
    for t in cands:
        if _vmem_bytes(H, W, t, K, itemsize) <= budget_bytes:
            return t
    return cands[-1]


def _pick_rh(H, W, tc, acc_budget_bytes=128 * 1024):
    """Largest divisor of H whose (RH, W, tc) f32 accumulator stays <= ~32 vregs."""
    best = 1
    for rh in range(1, H + 1):
        if H % rh == 0 and rh * W * tc * 4 <= acc_budget_bytes:
            best = rh
    return best


def residual_convmixer_block(x_nchw, w_dw, conv_bias, gamma, beta,
                             run_mean, run_var, eps=1e-5, approx_gelu=False):
    """fn(x) + x with fn = depthwise Conv2d(same) -> GELU -> BatchNorm2d (eval)."""
    N, C, H, W = x_nchw.shape
    K = w_dw.shape[-1]
    pad = K // 2
    pad_l = _round_up(pad, 8) if pad > 0 else 0
    Wp = _round_up(pad_l + W + pad, 8)

    x = jnp.transpose(x_nchw, (0, 2, 3, 1))                      # NCHW -> NHWC

    # (C, 1, K, K) torch layout -> (K, K, C); fold BN into per-channel scale/bias.
    w_hwc = jnp.transpose(w_dw[:, 0, :, :], (1, 2, 0)).astype(jnp.float32)
    scale = (gamma / jnp.sqrt(run_var + eps)).astype(jnp.float32)
    bias = (beta - run_mean * scale).astype(jnp.float32)

    itemsize = x_nchw.dtype.itemsize
    tc = _pick_tc(C, H, W, K, itemsize)
    rh = _pick_rh(H, W, tc)
    grid = (N, C // tc)

    est = _vmem_bytes(H, W, tc, K, itemsize)
    vmem_limit = int(min(64 * 2 ** 20, max(32 * 2 ** 20, est + 16 * 2 ** 20)))

    kern = functools.partial(_residual_block_kernel, H=H, W=W, K=K, RH=rh,
                             pad_l=pad_l, approx_gelu=approx_gelu)

    cost = pl.CostEstimate(
        flops=int(N * H * W * C * (2 * K * K + 10)),
        transcendentals=int(N * H * W * C),
        bytes_accessed=int(2 * N * H * W * C * itemsize),
    )

    out_nhwc = pl.pallas_call(
        kern,
        out_shape=jax.ShapeDtypeStruct((N, H, W, C), x.dtype),
        grid=grid,
        in_specs=[
            pl.BlockSpec((1, H, W, tc), lambda n, c: (n, 0, 0, c)),
            pl.BlockSpec((K, K, tc), lambda n, c: (0, 0, c)),
            pl.BlockSpec((1, 1, tc), lambda n, c: (0, 0, c)),
            pl.BlockSpec((1, 1, tc), lambda n, c: (0, 0, c)),
            pl.BlockSpec((1, 1, tc), lambda n, c: (0, 0, c)),
        ],
        out_specs=pl.BlockSpec((1, H, W, tc), lambda n, c: (n, 0, 0, c)),
        scratch_shapes=[pltpu.VMEM((H + 2 * pad, Wp, tc), jnp.float32)],
        compiler_params=pltpu.CompilerParams(
            dimension_semantics=("parallel", "parallel"),
            vmem_limit_bytes=vmem_limit),
        cost_estimate=cost,
    )(x, w_hwc,
      conv_bias.reshape(1, 1, C).astype(jnp.float32),
      scale.reshape(1, 1, C),
      bias.reshape(1, 1, C))

    return jnp.transpose(out_nhwc, (0, 3, 1, 2))                 # NHWC -> NCHW


def _reference(x_nchw, w_dw, conv_bias, gamma, beta, run_mean, run_var, eps=1e-5):
    """Pure-JAX reference of the same Residual block (NCHW in/out)."""
    N, C, H, W = x_nchw.shape
    x = jnp.transpose(x_nchw, (0, 2, 3, 1))
    w_hwio = jnp.transpose(w_dw, (2, 3, 1, 0))                   # (K,K,1,C)
    y = lax.conv_general_dilated(
        x, w_hwio, window_strides=(1, 1), padding="SAME",
        dimension_numbers=("NHWC", "HWIO", "NHWC"),
        feature_group_count=C)
    y = y + conv_bias
    y = jax.nn.gelu(y, approximate=False)
    y = (y - run_mean) / jnp.sqrt(run_var + eps) * gamma + beta
    y = y + x
    return jnp.transpose(y, (0, 3, 1, 2))


if __name__ == "__main__":
    key = jax.random.PRNGKey(0)
    k = jax.random.split(key, 7)

    N, C, H, W, K = 2, 4, 16, 16, 3
    x = jax.random.normal(k[0], (N, C, H, W), jnp.float32)

    # Deterministic synthetic parameters (ConvMixer residual block shapes).
    w_dw = 0.2 * jax.random.normal(k[1], (C, 1, K, K), jnp.float32)   # depthwise weight
    conv_bias = 0.1 * jax.random.normal(k[2], (C,), jnp.float32)
    gamma = 1.0 + 0.1 * jax.random.normal(k[3], (C,), jnp.float32)    # BN weight
    beta = 0.1 * jax.random.normal(k[4], (C,), jnp.float32)           # BN bias
    run_mean = 0.1 * jax.random.normal(k[5], (C,), jnp.float32)
    run_var = jnp.abs(1.0 + 0.1 * jax.random.normal(k[6], (C,), jnp.float32))

    out = residual_convmixer_block(x, w_dw, conv_bias, gamma, beta, run_mean, run_var)
    out = jax.block_until_ready(out)

    ref = _reference(x, w_dw, conv_bias, gamma, beta, run_mean, run_var)
    np.testing.assert_allclose(np.asarray(out), np.asarray(ref), atol=1e-5, rtol=1e-5)

    print("KERNEL_OK")
</pallas_src>

<mosaic_0001>
module attributes {stable_mosaic.version = 11 : i64} {
  func.func @_residual_block_kernel(%arg0: i32, %arg1: i32, %arg2: memref<1x16x16x4xf32, #tpu.memory_space<vmem>>, %arg3: memref<3x3x4xf32, #tpu.memory_space<vmem>>, %arg4: memref<1x1x4xf32, #tpu.memory_space<vmem>>, %arg5: memref<1x1x4xf32, #tpu.memory_space<vmem>>, %arg6: memref<1x1x4xf32, #tpu.memory_space<vmem>>, %arg7: memref<1x16x16x4xf32, #tpu.memory_space<vmem>>, %arg8: memref<18x32x4xf32, #tpu.memory_space<vmem>>) attributes {dimension_semantics = [#tpu.dimension_semantics<parallel>, #tpu.dimension_semantics<parallel>], iteration_bounds = array<i64: 2, 1>, scalar_prefetch = 0 : i64, scratch_operands = 1 : i64, tpu.core_type = #tpu.core_type<tc>, window_params = [{transform_indices = @transform_0, window_bounds = array<i64: 1, 16, 16, 4>}, {transform_indices = @transform_1, window_bounds = array<i64: 3, 3, 4>}, {transform_indices = @transform_2, window_bounds = array<i64: 1, 1, 4>}, {transform_indices = @transform_3, window_bounds = array<i64: 1, 1, 4>}, {transform_indices = @transform_4, window_bounds = array<i64: 1, 1, 4>}, {transform_indices = @transform_5, window_bounds = array<i64: 1, 16, 16, 4>}]} {
    %cst = arith.constant 0.000000e+00 : f32
    %0 = vector.broadcast %cst : f32 to vector<1x32x4xf32>
    %c0 = arith.constant 0 : index
    %c0_0 = arith.constant 0 : index
    %c0_1 = arith.constant 0 : index
    %1 = vector.load %arg8[%c0, %c0_0, %c0_1] : memref<18x32x4xf32, #tpu.memory_space<vmem>>, vector<1x32x4xf32>
    tpu.vector_store %arg8[%c0, %c0_0, %c0_1], %0 {strides = array<i32>} : memref<18x32x4xf32, #tpu.memory_space<vmem>>, vector<1x32x4xf32>,
    %cst_2 = arith.constant 0.000000e+00 : f32
    %2 = vector.broadcast %cst_2 : f32 to vector<1x32x4xf32>
    %c17 = arith.constant 17 : index
    %c0_3 = arith.constant 0 : index
    %c0_4 = arith.constant 0 : index
    %3 = vector.load %arg8[%c17, %c0_3, %c0_4] : memref<18x32x4xf32, #tpu.memory_space<vmem>>, vector<1x32x4xf32>
    tpu.vector_store %arg8[%c17, %c0_3, %c0_4], %2 {strides = array<i32>} : memref<18x32x4xf32, #tpu.memory_space<vmem>>, vector<1x32x4xf32>,
    %cst_5 = arith.constant 0.000000e+00 : f32
    %4 = vector.broadcast %cst_5 : f32 to vector<16x8x4xf32>
    %c1 = arith.constant 1 : index
    %c0_6 = arith.constant 0 : index
    %c0_7 = arith.constant 0 : index
    %5 = vector.load %arg8[%c1, %c0_6, %c0_7] : memref<18x32x4xf32, #tpu.memory_space<vmem>>, vector<16x8x4xf32>
    tpu.vector_store %arg8[%c1, %c0_6, %c0_7], %4 {strides = array<i32>} : memref<18x32x4xf32, #tpu.memory_space<vmem>>, vector<16x8x4xf32>,
    %cst_8 = arith.constant 0.000000e+00 : f32
    %6 = vector.broadcast %cst_8 : f32 to vector<16x8x4xf32>
    %c1_9 = arith.constant 1 : index
    %c24 = arith.constant 24 : index
    %c0_10 = arith.constant 0 : index
    %7 = vector.load %arg8[%c1_9, %c24, %c0_10] : memref<18x32x4xf32, #tpu.memory_space<vmem>>, vector<16x8x4xf32>
    tpu.vector_store %arg8[%c1_9, %c24, %c0_10], %6 {strides = array<i32>} : memref<18x32x4xf32, #tpu.memory_space<vmem>>, vector<16x8x4xf32>,
    %c0_11 = arith.constant 0 : index
    %c0_12 = arith.constant 0 : index
    %c0_13 = arith.constant 0 : index
    %c0_14 = arith.constant 0 : index
    %8 = vector.load %arg2[%c0_11, %c0_12, %c0_13, %c0_14] : memref<1x16x16x4xf32, #tpu.memory_space<vmem>>, vector<1x16x16x4xf32>
    %9 = vector.shape_cast %8 : vector<1x16x16x4xf32> to vector<16x16x4xf32>
    %c1_15 = arith.constant 1 : index
    %c8 = arith.constant 8 : index
    %c0_16 = arith.constant 0 : index
    %10 = vector.load %arg8[%c1_15, %c8, %c0_16] : memref<18x32x4xf32, #tpu.memory_space<vmem>>, vector<16x16x4xf32>
    tpu.vector_store %arg8[%c1_15, %c8, %c0_16], %9 {strides = array<i32>} : memref<18x32x4xf32, #tpu.memory_space<vmem>>, vector<16x16x4xf32>,
    %c0_17 = arith.constant 0 : index
    %c0_18 = arith.constant 0 : index
    %c0_19 = arith.constant 0 : index
    %11 = vector.load %arg4[%c0_17, %c0_18, %c0_19] : memref<1x1x4xf32, #tpu.memory_space<vmem>>, vector<1x1x4xf32>
    %12 = vector.shape_cast %11 : vector<1x1x4xf32> to vector<4xf32>
    %c0_20 = arith.constant 0 : index
    %c0_21 = arith.constant 0 : index
    %c0_22 = arith.constant 0 : index
    %13 = vector.load %arg5[%c0_20, %c0_21, %c0_22] : memref<1x1x4xf32, #tpu.memory_space<vmem>>, vector<1x1x4xf32>
    %14 = vector.shape_cast %13 : vector<1x1x4xf32> to vector<4xf32>
    %c0_23 = arith.constant 0 : index
    %c0_24 = arith.constant 0 : index
    %c0_25 = arith.constant 0 : index
    %15 = vector.load %arg6[%c0_23, %c0_24, %c0_25] : memref<1x1x4xf32, #tpu.memory_space<vmem>>, vector<1x1x4xf32>
    %16 = vector.shape_cast %15 : vector<1x1x4xf32> to vector<4xf32>
    %cst_26 = arith.constant 0.000000e+00 : f32
    %17 = vector.broadcast %cst_26 : f32 to vector<16x16x4xf32>
    %c0_27 = arith.constant 0 : index
    %c7 = arith.constant 7 : index
    %c0_28 = arith.constant 0 : index
    %18 = vector.load %arg8[%c0_27, %c7, %c0_28] : memref<18x32x4xf32, #tpu.memory_space<vmem>>, vector<16x16x4xf32>
    %c0_29 = arith.constant 0 : index
    %c0_30 = arith.constant 0 : index
    %c0_31 = arith.constant 0 : index
    %19 = vector.load %arg3[%c0_29, %c0_30, %c0_31] : memref<3x3x4xf32, #tpu.memory_space<vmem>>, vector<1x1x4xf32>
    %20 = vector.shape_cast %19 : vector<1x1x4xf32> to vector<4xf32>
    %21 = vector.shape_cast %20 : vector<4xf32> to vector<1x1x4xf32>
    %22 = vector.broadcast %21 : vector<1x1x4xf32> to vector<16x16x4xf32>
    %23 = arith.mulf %18, %22 : vector<16x16x4xf32>
    %24 = arith.addf %17, %23 : vector<16x16x4xf32>
    %c0_32 = arith.constant 0 : index
    %c8_33 = arith.constant 8 : index
    %c0_34 = arith.constant 0 : index
    %25 = vector.load %arg8[%c0_32, %c8_33, %c0_34] : memref<18x32x4xf32, #tpu.memory_space<vmem>>, vector<16x16x4xf32>
    %c0_35 = arith.constant 0 : index
    %c1_36 = arith.constant 1 : index
    %c0_37 = arith.constant 0 : index
    %26 = vector.load %arg3[%c0_35, %c1_36, %c0_37] : memref<3x3x4xf32, #tpu.memory_space<vmem>>, vector<1x1x4xf32>
    %27 = vector.shape_cast %26 : vector<1x1x4xf32> to vector<4xf32>
    %28 = vector.shape_cast %27 : vector<4xf32> to vector<1x1x4xf32>
    %29 = vector.broadcast %28 : vector<1x1x4xf32> to vector<16x16x4xf32>
    %30 = arith.mulf %25, %29 : vector<16x16x4xf32>
    %31 = arith.addf %24, %30 : vector<16x16x4xf32>
    %c0_38 = arith.constant 0 : index
    %c9 = arith.constant 9 : index
    %c0_39 = arith.constant 0 : index
    %32 = vector.load %arg8[%c0_38, %c9, %c0_39] : memref<18x32x4xf32, #tpu.memory_space<vmem>>, vector<16x16x4xf32>
    %c0_40 = arith.constant 0 : index
    %c2 = arith.constant 2 : index
    %c0_41 = arith.constant 0 : index
    %33 = vector.load %arg3[%c0_40, %c2, %c0_41] : memref<3x3x4xf32, #tpu.memory_space<vmem>>, vector<1x1x4xf32>
    %34 = vector.shape_cast %33 : vector<1x1x4xf32> to vector<4xf32>
    %35 = vector.shape_cast %34 : vector<4xf32> to vector<1x1x4xf32>
    %36 = vector.broadcast %35 : vector<1x1x4xf32> to vector<16x16x4xf32>
    %37 = arith.mulf %32, %36 : vector<16x16x4xf32>
    %38 = arith.addf %31, %37 : vector<16x16x4xf32>
    %c1_42 = arith.constant 1 : index
    %c7_43 = arith.constant 7 : index
    %c0_44 = arith.constant 0 : index
    %39 = vector.load %arg8[%c1_42, %c7_43, %c0_44] : memref<18x32x4xf32, #tpu.memory_space<vmem>>, vector<16x16x4xf32>
    %c1_45 = arith.constant 1 : index
    %c0_46 = arith.constant 0 : index
    %c0_47 = arith.constant 0 : index
    %40 = vector.load %arg3[%c1_45, %c0_46, %c0_47] : memref<3x3x4xf32, #tpu.memory_space<vmem>>, vector<1x1x4xf32>
    %41 = vector.shape_cast %40 : vector<1x1x4xf32> to vector<4xf32>
    %42 = vector.shape_cast %41 : vector<4xf32> to vector<1x1x4xf32>
    %43 = vector.broadcast %42 : vector<1x1x4xf32> to vector<16x16x4xf32>
    %44 = arith.mulf %39, %43 : vector<16x16x4xf32>
    %45 = arith.addf %38, %44 : vector<16x16x4xf32>
    %c1_48 = arith.constant 1 : index
    %c8_49 = arith.constant 8 : index
    %c0_50 = arith.constant 0 : index
    %46 = vector.load %arg8[%c1_48, %c8_49, %c0_50] : memref<18x32x4xf32, #tpu.memory_space<vmem>>, vector<16x16x4xf32>
    %c1_51 = arith.constant 1 : index
    %c1_52 = arith.constant 1 : index
    %c0_53 = arith.constant 0 : index
    %47 = vector.load %arg3[%c1_51, %c1_52, %c0_53] : memref<3x3x4xf32, #tpu.memory_space<vmem>>, vector<1x1x4xf32>
    %48 = vector.shape_cast %47 : vector<1x1x4xf32> to vector<4xf32>
    %49 = vector.shape_cast %48 : vector<4xf32> to vector<1x1x4xf32>
    %50 = vector.broadcast %49 : vector<1x1x4xf32> to vector<16x16x4xf32>
    %51 = arith.mulf %46, %50 : vector<16x16x4xf32>
    %52 = arith.addf %45, %51 : vector<16x16x4xf32>
    %c1_54 = arith.constant 1 : index
    %c9_55 = arith.constant 9 : index
    %c0_56 = arith.constant 0 : index
    %53 = vector.load %arg8[%c1_54, %c9_55, %c0_56] : memref<18x32x4xf32, #tpu.memory_space<vmem>>, vector<16x16x4xf32>
    %c1_57 = arith.constant 1 : index
    %c2_58 = arith.constant 2 : index
    %c0_59 = arith.constant 0 : index
    %54 = vector.load %arg3[%c1_57, %c2_58, %c0_59] : memref<3x3x4xf32, #tpu.memory_space<vmem>>, vector<1x1x4xf32>
    %55 = vector.shape_cast %54 : vector<1x1x4xf32> to vector<4xf32>
    %56 = vector.shape_cast %55 : vector<4xf32> to vector<1x1x4xf32>
    %57 = vector.broadcast %56 : vector<1x1x4xf32> to vector<16x16x4xf32>
    %58 = arith.mulf %53, %57 : vector<16x16x4xf32>
    %59 = arith.addf %52, %58 : vector<16x16x4xf32>
    %c2_60 = arith.constant 2 : index
    %c7_61 = arith.constant 7 : index
    %c0_62 = arith.constant 0 : index
    %60 = vector.load %arg8[%c2_60, %c7_61, %c0_62] : memref<18x32x4xf32, #tpu.memory_space<vmem>>, vector<16x16x4xf32>
    %c2_63 = arith.constant 2 : index
    %c0_64 = arith.constant 0 : index
    %c0_65 = arith.constant 0 : index
    %61 = vector.load %arg3[%c2_63, %c0_64, %c0_65] : memref<3x3x4xf32, #tpu.memory_space<vmem>>, vector<1x1x4xf32>
    %62 = vector.shape_cast %61 : vector<1x1x4xf32> to vector<4xf32>
    %63 = vector.shape_cast %62 : vector<4xf32> to vector<1x1x4xf32>
    %64 = vector.broadcast %63 : vector<1x1x4xf32> to vector<16x16x4xf32>
    %65 = arith.mulf %60, %64 : vector<16x16x4xf32>
    %66 = arith.addf %59, %65 : vector<16x16x4xf32>
    %c2_66 = arith.constant 2 : index
    %c8_67 = arith.constant 8 : index
    %c0_68 = arith.constant 0 : index
    %67 = vector.load %arg8[%c2_66, %c8_67, %c0_68] : memref<18x32x4xf32, #tpu.memory_space<vmem>>, vector<16x16x4xf32>
    %c2_69 = arith.constant 2 : index
    %c1_70 = arith.constant 1 : index
    %c0_71 = arith.constant 0 : index
    %68 = vector.load %arg3[%c2_69, %c1_70, %c0_71] : memref<3x3x4xf32, #tpu.memory_space<vmem>>, vector<1x1x4xf32>
    %69 = vector.shape_cast %68 : vector<1x1x4xf32> to vector<4xf32>
    %70 = vector.shape_cast %69 : vector<4xf32> to vector<1x1x4xf32>
    %71 = vector.broadcast %70 : vector<1x1x4xf32> to vector<16x16x4xf32>
    %72 = arith.mulf %67, %71 : vector<16x16x4xf32>
    %73 = arith.addf %66, %72 : vector<16x16x4xf32>
    %c2_72 = arith.constant 2 : index
    %c9_73 = arith.constant 9 : index
    %c0_74 = arith.constant 0 : index
    %74 = vector.load %arg8[%c2_72, %c9_73, %c0_74] : memref<18x32x4xf32, #tpu.memory_space<vmem>>, vector<16x16x4xf32>
    %c2_75 = arith.constant 2 : index
    %c2_76 = arith.constant 2 : index
    %c0_77 = arith.constant 0 : index
    %75 = vector.load %arg3[%c2_75, %c2_76, %c0_77] : memref<3x3x4xf32, #tpu.memory_space<vmem>>, vector<1x1x4xf32>
    %76 = vector.shape_cast %75 : vector<1x1x4xf32> to vector<4xf32>
    %77 = vector.shape_cast %76 : vector<4xf32> to vector<1x1x4xf32>
    %78 = vector.broadcast %77 : vector<1x1x4xf32> to vector<16x16x4xf32>
    %79 = arith.mulf %74, %78 : vector<16x16x4xf32>
    %80 = arith.addf %73, %79 : vector<16x16x4xf32>
    %81 = vector.shape_cast %12 : vector<4xf32> to vector<1x1x4xf32>
    %82 = vector.broadcast %81 : vector<1x1x4xf32> to vector<16x16x4xf32>
    %83 = arith.addf %80, %82 : vector<16x16x4xf32>
    %cst_78 = arith.constant 5.000000e-01 : f32
    %84 = vector.broadcast %cst_78 : f32 to vector<16x16x4xf32>
    %85 = arith.mulf %84, %83 : vector<16x16x4xf32>
    %cst_79 = arith.constant 0.707106769 : f32
    %86 = vector.broadcast %cst_79 : f32 to vector<16x16x4xf32>
    %87 = arith.mulf %83, %86 : vector<16x16x4xf32>
    %88 = math.erf %87 : vector<16x16x4xf32>
    %cst_80 = arith.constant 1.000000e+00 : f32
    %89 = vector.broadcast %cst_80 : f32 to vector<16x16x4xf32>
    %90 = arith.addf %89, %88 : vector<16x16x4xf32>
    %91 = arith.mulf %85, %90 : vector<16x16x4xf32>
    %c0_81 = arith.constant 0 : index
    %c0_82 = arith.constant 0 : index
    %c0_83 = arith.constant 0 : index
    %c0_84 = arith.constant 0 : index
    %92 = vector.load %arg2[%c0_81, %c0_82, %c0_83, %c0_84] : memref<1x16x16x4xf32, #tpu.memory_space<vmem>>, vector<1x16x16x4xf32>
    %93 = vector.shape_cast %92 : vector<1x16x16x4xf32> to vector<16x16x4xf32>
    %94 = vector.shape_cast %14 : vector<4xf32> to vector<1x1x4xf32>
    %95 = vector.broadcast %94 : vector<1x1x4xf32> to vector<16x16x4xf32>
    %96 = arith.mulf %91, %95 : vector<16x16x4xf32>
    %97 = vector.shape_cast %16 : vector<4xf32> to vector<1x1x4xf32>
    %98 = vector.broadcast %97 : vector<1x1x4xf32> to vector<16x16x4xf32>
    %99 = arith.addf %96, %98 : vector<16x16x4xf32>
    %100 = arith.addf %99, %93 : vector<16x16x4xf32>
    %c0_85 = arith.constant 0 : index
    %c0_86 = arith.constant 0 : index
    %c0_87 = arith.constant 0 : index
    %c0_88 = arith.constant 0 : index
    %101 = vector.load %arg7[%c0_85, %c0_86, %c0_87, %c0_88] : memref<1x16x16x4xf32, #tpu.memory_space<vmem>>, vector<1x16x16x4xf32>
    %102 = vector.shape_cast %101 : vector<1x16x16x4xf32> to vector<16x16x4xf32>
    %103 = vector.shape_cast %100 : vector<16x16x4xf32> to vector<1x16x16x4xf32>
    tpu.vector_store %arg7[%c0_85, %c0_86, %c0_87, %c0_88], %103 {strides = array<i32>} : memref<1x16x16x4xf32, #tpu.memory_space<vmem>>, vector<1x16x16x4xf32>,
    return
  }
  func.func @transform_0(%arg0: i32, %arg1: i32) -> (i32, i32, i32, i32) {
    %c0_i32 = arith.constant 0 : i32
    %c0_i32_0 = arith.constant 0 : i32
    %c0_i32_1 = arith.constant 0 : i32
    return %arg0, %c0_i32, %c0_i32_0, %arg1 : i32, i32, i32, i32
  }
  func.func @transform_1(%arg0: i32, %arg1: i32) -> (i32, i32, i32) {
    %c0_i32 = arith.constant 0 : i32
    %c0_i32_0 = arith.constant 0 : i32
    %c0_i32_1 = arith.constant 0 : i32
    return %c0_i32, %c0_i32_0, %arg1 : i32, i32, i32
  }
  func.func @transform_2(%arg0: i32, %arg1: i32) -> (i32, i32, i32) {
    %c0_i32 = arith.constant 0 : i32
    %c0_i32_0 = arith.constant 0 : i32
    %c0_i32_1 = arith.constant 0 : i32
    return %c0_i32, %c0_i32_0, %arg1 : i32, i32, i32
  }
  func.func @transform_3(%arg0: i32, %arg1: i32) -> (i32, i32, i32) {
    %c0_i32 = arith.constant 0 : i32
    %c0_i32_0 = arith.constant 0 : i32
    %c0_i32_1 = arith.constant 0 : i32
    return %c0_i32, %c0_i32_0, %arg1 : i32, i32, i32
  }
  func.func @transform_4(%arg0: i32, %arg1: i32) -> (i32, i32, i32) {
    %c0_i32 = arith.constant 0 : i32
    %c0_i32_0 = arith.constant 0 : i32
    %c0_i32_1 = arith.constant 0 : i32
    return %c0_i32, %c0_i32_0, %arg1 : i32, i32, i32
  }
  func.func @transform_5(%arg0: i32, %arg1: i32) -> (i32, i32, i32, i32) {
    %c0_i32 = arith.constant 0 : i32
    %c0_i32_0 = arith.constant 0 : i32
    %c0_i32_1 = arith.constant 0 : i32
    return %arg0, %c0_i32, %c0_i32_0, %arg1 : i32, i32, i32, i32
  }
}

</mosaic_0001>

<bundles_post_ra>
// kernel: tpu_custom_call.1
= control target key start
LH: loop header
LB: loop body
LE: loop exit
PB: predicated region body
PF: predicated region fallthrough
CT: control target
= control target key end

     0   :  { %s2034_s18 = smov 0   ;;  %s2036_s19 = smov 0   ;;  %s3268_s0 = inlined_call_operand.vmem [shape: f32[2,16,16,4], index: 0, kind: input, shape index: {}]   ;;  %s3269_s1 = inlined_call_operand.vmem [shape: f32[3,3,4], index: 1, kind: input, shape index: {}]   ;;  %s3270_s2 = inlined_call_operand.vmem [shape: f32[1,1,4], index: 2, kind: input, shape index: {}]   ;;  %s3271_s3 = inlined_call_operand.vmem [shape: f32[1,1,4], index: 3, kind: input, shape index: {}]   ;;  %s3272_s4 = inlined_call_operand.vmem [shape: f32[1,1,4], index: 4, kind: input, shape index: {}]   ;;  %s3273_s5 = inlined_call_operand.vmem [shape: f32[2,16,16,4], index: 5, kind: output, shape index: {}]  }
   0x1   :  { %s2038_s20 = smov 0  }
   0x2 LB: > { %s27_s21 = sadd.s32 1, %s1997_s19  ;;  %p1850_p0 = scmp.ge.s32.totalorder %s2001_s20, 1  ;;  %s2001_s20 = sphi %s2038_s20, %s15_s20   ;;  %s1997_s19 = sphi %s2036_s19, %s3376_s19   ;;  %s1993_s18 = sphi %s2034_s18, %s3375_s18  }
   0x3   : > { %p29_p1 = scmp.ge.s32.totalorder %s27_s21, 2  ;;  %p239_p2 = scmp.lt.s32.totalorder %s2001_s20, 3 }
   0x5   : > { %s3378_s21 = smov (%p29_p1, %s27_s21), 0  ;;  %p240_p3 = pnand %p1850_p0, %p239_p2 }
   0x7   : > { %243 = sbr.rel (%p240_p3) target bundleno = 283 (0x11b), region = 40 }
   0xc   : > { %vm315_vm0 = vcmask 31744   ;;  %p286_p4 = scmp.lt.s32.totalorder %s1993_s18, 1  ;;  %v2003_v0 = vmov 0.0   ;;  %v2120_v4 = vld [vmem:[%s3269_s1] ss:$0 sm:$0xff] }
   0xd   : > { %316 = vst.msk [vmem:[#allocation2] sm:$0xff] %vm315_vm0, %v2003_v0  ;;  %317 = vst.msk [vmem:[#allocation2 + $0x8] sm:$0xff] %vm315_vm0, %v2003_v0  ;;  %v2125_v5 = vld [vmem:[%s3269_s1 + $0x1] ss:$0 sm:$0xff]  ;;  %v2183_v23 = vld [vmem:[%s3269_s1 + $0x4] ss:$0 sm:$0xff] }
   0xe   : > { %318 = vst.msk [vmem:[#allocation2 + $0x10] sm:$0xff] %vm315_vm0, %v2003_v0  ;;  %319 = vst.msk [vmem:[#allocation2 + $0x18] sm:$0xff] %vm315_vm0, %v2003_v0  ;;  %s3380_s18 = smov (!%p286_p4, %s1993_s18), 1  ;;  %v2188_v24 = vld [vmem:[%s3269_s1 + $0x5] ss:$0 sm:$0xff] }
   0xf   : > { %321 = vst.msk [vmem:[#allocation2 + $0x220] sm:$0xff] %vm315_vm0, %v2003_v0  ;;  %322 = vst.msk [vmem:[#allocation2 + $0x228] sm:$0xff] %vm315_vm0, %v2003_v0  ;;  %s1875_s22 = sshll.u32 %s3380_s18, 8  ;;  %v2200_v28 = vld [vmem:[%s3269_s1 + $0x8] ss:$0 sm:$0xff] }
  0x10   : > { %323 = vst.msk [vmem:[#allocation2 + $0x230] sm:$0xff] %vm315_vm0, %v2003_v0  ;;  %324 = vst.msk [vmem:[#allocation2 + $0x238] sm:$0xff] %vm315_vm0, %v2003_v0  ;;  %s2106_s25 = scalar_lea.vmem %s3268_s0, %s1875_s22  ;;  %v2205_v29 = vld [vmem:[%s3269_s1 + $0x9] ss:$0 sm:$0xff]  ;;  %s2621_s8 = scalar_lea.vmem %s3273_s5, %s1875_s22 }
  0x11   : > { %326 = vst.msk [vmem:[#allocation2 + $0x20] sm:$0xff] %vm315_vm0, %v2003_v0  ;;  %327 = vst.msk [vmem:[#allocation2 + $0x40] sm:$0xff] %vm315_vm0, %v2003_v0  ;;  %v2109_v1 = vld [vmem:[%s2106_s25] sm:$0xff]  ;;  %v2112_v2 = vld [vmem:[%s2106_s25 + $0x8] sm:$0xff] }
  0x12   : > { %328 = vst.msk [vmem:[#allocation2 + $0x60] sm:$0xff] %vm315_vm0, %v2003_v0  ;;  %329 = vst.msk [vmem:[#allocation2 + $0x80] sm:$0xff] %vm315_vm0, %v2003_v0  ;;  %v2115_v3 = vld [vmem:[%s2106_s25 + $0x10] sm:$0xff]  ;;  %v2134_v6 = vld [vmem:[%s2106_s25 + $0x18] sm:$0xff] }
  0x13   : > { %330 = vst.msk [vmem:[#allocation2 + $0xa0] sm:$0xff] %vm315_vm0, %v2003_v0  ;;  %331 = vst.msk [vmem:[#allocation2 + $0xc0] sm:$0xff] %vm315_vm0, %v2003_v0  ;;  %v2137_v7 = vld [vmem:[%s2106_s25 + $0x20] sm:$0xff]  ;;  %v2140_v8 = vld [vmem:[%s2106_s25 + $0x28] sm:$0xff] }
  0x14   : > { %332 = vst.msk [vmem:[#allocation2 + $0xe0] sm:$0xff] %vm315_vm0, %v2003_v0  ;;  %333 = vst.msk [vmem:[#allocation2 + $0x100] sm:$0xff] %vm315_vm0, %v2003_v0  ;;  %v425_v9 = vld [vmem:[#allocation2 + $0x7] sm:$0xff]  ;;  %v2149_v13 = vld [vmem:[%s2106_s25 + $0x30] sm:$0xff] }
  0x15   : > { %334 = vst.msk [vmem:[#allocation2 + $0x120] sm:$0xff] %vm315_vm0, %v2003_v0  ;;  %335 = vst.msk [vmem:[#allocation2 + $0x140] sm:$0xff] %vm315_vm0, %v2003_v0  ;;  %v426_v10 = vld [vmem:[#allocation2 + $0xf] sm:$0xff]  ;;  %v2152_v14 = vld [vmem:[%s2106_s25 + $0x38] sm:$0xff]  ;;  %v462_v21 = vmul.f32 %v2120_v4, %v425_v9 }
  0x16   : > { %336 = vst.msk [vmem:[#allocation2 + $0x160] sm:$0xff] %vm315_vm0, %v2003_v0  ;;  %337 = vst.msk [vmem:[#allocation2 + $0x180] sm:$0xff] %vm315_vm0, %v2003_v0  ;;  %v526_v11 = vld [vmem:[#allocation2 + $0x8] sm:$0xff]  ;;  %v527_v12 = vld [vmem:[#allocation2 + $0x10] sm:$0xff]  ;;  %v463_v30 = vmul.f32 %v2120_v4, %v426_v10 }
  0x17   : > { %338 = vst.msk [vmem:[#allocation2 + $0x1a0] sm:$0xff] %vm315_vm0, %v2003_v0  ;;  %339 = vst.msk [vmem:[#allocation2 + $0x1c0] sm:$0xff] %vm315_vm0, %v2003_v0  ;;  %v2159_v15 = vld [vmem:[%s2106_s25 + $0x40] sm:$0xff]  ;;  %v2162_v16 = vld [vmem:[%s2106_s25 + $0x48] sm:$0xff]  ;;  %v563_v22 = vmul.f32 %v2125_v5, %v526_v11  ;;  %v564_v31 = vmul.f32 %v2125_v5, %v527_v12 }
  0x18   : > { %340 = vst.msk [vmem:[#allocation2 + $0x1e0] sm:$0xff] %vm315_vm0, %v2003_v0  ;;  %341 = vst.msk [vmem:[#allocation2 + $0x200] sm:$0xff] %vm315_vm0, %v2003_v0  ;;  %v2165_v17 = vld [vmem:[%s2106_s25 + $0x50] sm:$0xff]  ;;  %v2174_v18 = vld [vmem:[%s2106_s25 + $0x58] sm:$0xff] }
  0x19   : > { %342 = vst.msk [vmem:[#allocation2 + $0x38] sm:$0xff] %vm315_vm0, %v2003_v0  ;;  %343 = vst.msk [vmem:[#allocation2 + $0x58] sm:$0xff] %vm315_vm0, %v2003_v0  ;;  %v370_v19 = vld [vmem:[%s2106_s25 + $0x60] sm:$0xff]  ;;  %v371_v20 = vld [vmem:[%s2106_s25 + $0x68] sm:$0xff]  ;;  %v2218_v41 = vadd.f32 %v563_v22, %v462_v21  ;;  %v2227_v48 = vadd.f32 %v564_v31, %v463_v30 }
  0x1a   : > { %344 = vst.msk [vmem:[#allocation2 + $0x78] sm:$0xff] %vm315_vm0, %v2003_v0  ;;  %345 = vst.msk [vmem:[#allocation2 + $0x98] sm:$0xff] %vm315_vm0, %v2003_v0  ;;  %v372_v25 = vld [vmem:[%s2106_s25 + $0x70] sm:$0xff]  ;;  %v373_v26 = vld [vmem:[%s2106_s25 + $0x78] sm:$0xff] }
  0x1b   : > { %346 = vst.msk [vmem:[#allocation2 + $0xb8] sm:$0xff] %vm315_vm0, %v2003_v0  ;;  %347 = vst.msk [vmem:[#allocation2 + $0xd8] sm:$0xff] %vm315_vm0, %v2003_v0  ;;  %v374_v27 = vld [vmem:[%s2106_s25 + $0x80] sm:$0xff]  ;;  %v375_v32 = vld [vmem:[%s2106_s25 + $0x88] sm:$0xff] }
  0x1c   : > { %348 = vst.msk [vmem:[#allocation2 + $0xf8] sm:$0xff] %vm315_vm0, %v2003_v0  ;;  %349 = vst.msk [vmem:[#allocation2 + $0x118] sm:$0xff] %vm315_vm0, %v2003_v0  ;;  %v376_v33 = vld [vmem:[%s2106_s25 + $0x90] sm:$0xff]  ;;  %v377_v34 = vld [vmem:[%s2106_s25 + $0x98] sm:$0xff] }
  0x1d   : > { %350 = vst.msk [vmem:[#allocation2 + $0x138] sm:$0xff] %vm315_vm0, %v2003_v0  ;;  %351 = vst.msk [vmem:[#allocation2 + $0x158] sm:$0xff] %vm315_vm0, %v2003_v0 }
  0x1e   : > { %352 = vst.msk [vmem:[#allocation2 + $0x178] sm:$0xff] %vm315_vm0, %v2003_v0  ;;  %353 = vst.msk [vmem:[#allocation2 + $0x198] sm:$0xff] %vm315_vm0, %v2003_v0 }
  0x1f   : > { %354 = vst.msk [vmem:[#allocation2 + $0x1b8] sm:$0xff] %vm315_vm0, %v2003_v0  ;;  %355 = vst.msk [vmem:[#allocation2 + $0x1d8] sm:$0xff] %vm315_vm0, %v2003_v0 }
  0x20   : > { %356 = vst.msk [vmem:[#allocation2 + $0x1f8] sm:$0xff] %vm315_vm0, %v2003_v0  ;;  %357 = vst.msk [vmem:[#allocation2 + $0x218] sm:$0xff] %vm315_vm0, %v2003_v0 }
  0x21   : > { %3301 = vst [vmem:[#allocation3_spill] sm:$0xff] %v2109_v1  ;;  %3302 = vst [vmem:[#allocation4_spill] sm:$0xff] %v2112_v2 }
  0x22   : > { %3303 = vst [vmem:[#allocation5_spill] sm:$0xff] %v2115_v3  ;;  %3304 = vst [vmem:[#allocation6_spill] sm:$0xff] %v2120_v4 }
  0x23   : > { %3305 = vst [vmem:[#allocation7_spill] sm:$0xff] %v2125_v5  ;;  %390 = vst.msk [vmem:[#allocation2 + $0x28] sm:$0xff] %vm315_vm0, %v2109_v1  ;;  %v380_v1 = vld [vmem:[%s2106_s25 + $0xb0] sm:$0xff] }
  0x24   : > { %391 = vst.msk [vmem:[#allocation2 + $0x30] sm:$0xff] %vm315_vm0, %v2112_v2  ;;  %392 = vst.msk [vmem:[#allocation2 + $0x48] sm:$0xff] %vm315_vm0, %v2115_v3 }
  0x25   : > { %3306 = vst [vmem:[#allocation8_spill] sm:$0xff] %v2134_v6  ;;  %3307 = vst [vmem:[#allocation9_spill] sm:$0xff] %v2137_v7 }
  0x26   : > { %3308 = vst [vmem:[#allocation10_spill] sm:$0xff] %v2140_v8  ;;  %393 = vst.msk [vmem:[#allocation2 + $0x50] sm:$0xff] %vm315_vm0, %v2134_v6 }
  0x27   : > { %394 = vst.msk [vmem:[#allocation2 + $0x68] sm:$0xff] %vm315_vm0, %v2137_v7  ;;  %395 = vst.msk [vmem:[#allocation2 + $0x70] sm:$0xff] %vm315_vm0, %v2140_v8  ;;  %v2349_v8 = vld [vmem:[%s3269_s1 + $0x2] ss:$0 sm:$0xff] }
  0x28   : > { %3309 = vst [vmem:[#allocation11_spill] sm:$0xff] %v2149_v13  ;;  %3310 = vst [vmem:[#allocation12_spill] sm:$0xff] %v2152_v14 }
  0x29   : > { %396 = vst.msk [vmem:[#allocation2 + $0x88] sm:$0xff] %vm315_vm0, %v2149_v13  ;;  %397 = vst.msk [vmem:[#allocation2 + $0x90] sm:$0xff] %vm315_vm0, %v2152_v14  ;;  %v378_v14 = vld [vmem:[%s2106_s25 + $0xa0] sm:$0xff]  ;;  %v379_v13 = vld [vmem:[%s2106_s25 + $0xa8] sm:$0xff] }
  0x2a   : > { %3311 = vst [vmem:[#allocation13_spill] sm:$0xff] %v2159_v15  ;;  %3312 = vst [vmem:[#allocation14_spill] sm:$0xff] %v2162_v16  ;;  %v427_v35 = vld [vmem:[#allocation2 + $0x27] sm:$0xff] }
  0x2b   : > { %3313 = vst [vmem:[#allocation15_spill] sm:$0xff] %v2165_v17  ;;  %398 = vst.msk [vmem:[#allocation2 + $0xa8] sm:$0xff] %vm315_vm0, %v2159_v15  ;;  %v528_v36 = vld [vmem:[#allocation2 + $0x28] sm:$0xff]  ;;  %v529_v38 = vld [vmem:[#allocation2 + $0x30] sm:$0xff]  ;;  %v464_v42 = vmul.f32 %v2120_v4, %v427_v35  ;;  %v2222_v46 = vmul.f32 %v2183_v23, %v427_v35 }
  0x2c   : > { %399 = vst.msk [vmem:[#allocation2 + $0xb0] sm:$0xff] %vm315_vm0, %v2162_v16  ;;  %400 = vst.msk [vmem:[#allocation2 + $0xc8] sm:$0xff] %vm315_vm0, %v2165_v17  ;;  %v428_v37 = vld [vmem:[#allocation2 + $0x2f] sm:$0xff]  ;;  %v429_v39 = vld [vmem:[#allocation2 + $0x47] sm:$0xff]  ;;  %v2225_v47 = vmul.f32 %v2188_v24, %v528_v36  ;;  %v565_v49 = vmul.f32 %v2125_v5, %v528_v36  ;;  %v2240_v54 = vmul.f32 %v2188_v24, %v529_v38 }
  0x2d   : > { %3314 = vst [vmem:[#allocation16_spill] sm:$0xff] %v2174_v18  ;;  %3315 = vst [vmem:[#allocation17_spill] sm:$0xff] %v2183_v23  ;;  %v530_v40 = vld [vmem:[#allocation2 + $0x48] sm:$0xff]  ;;  %v531_v44 = vld [vmem:[#allocation2 + $0x50] sm:$0xff]  ;;  %v2231_v51 = vmul.f32 %v2200_v28, %v429_v39  ;;  %v2237_v53 = vmul.f32 %v2183_v23, %v428_v37  ;;  %v2249_v59 = vmul.f32 %v2183_v23, %v429_v39 }
  0x2e   : > { %401 = vst.msk [vmem:[#allocation2 + $0xd0] sm:$0xff] %vm315_vm0, %v2174_v18  ;;  %402 = vst.msk [vmem:[#allocation2 + $0xe8] sm:$0xff] %vm315_vm0, %v370_v19  ;;  %v430_v43 = vld [vmem:[#allocation2 + $0x4f] sm:$0xff]  ;;  %v431_v45 = vld [vmem:[#allocation2 + $0x67] sm:$0xff]  ;;  %v2234_v52 = vmul.f32 %v2205_v29, %v530_v40  ;;  %v2246_v58 = vmul.f32 %v2205_v29, %v531_v44  ;;  %v465_v60 = vmul.f32 %v2120_v4, %v428_v37 }
  0x2f   : > { %403 = vst.msk [vmem:[#allocation2 + $0xf0] sm:$0xff] %vm315_vm0, %v371_v20  ;;  %3316 = vst [vmem:[#allocation18_spill] sm:$0xff] %v2205_v29  ;;  %v532_v50 = vld [vmem:[#allocation2 + $0x68] sm:$0xff]  ;;  %v533_v56 = vld [vmem:[#allocation2 + $0x70] sm:$0xff]  ;;  %v2243_v57 = vmul.f32 %v2200_v28, %v430_v43  ;;  %v2252_v61 = vadd.f32 %v565_v49, %v464_v42  ;;  %v2255_v62 = vmul.f32 %v2188_v24, %v530_v40 }
  0x30   : > { %404 = vst.msk [vmem:[#allocation2 + $0x108] sm:$0xff] %vm315_vm0, %v372_v25  ;;  %405 = vst.msk [vmem:[#allocation2 + $0x110] sm:$0xff] %vm315_vm0, %v373_v26  ;;  %v432_v55 = vld [vmem:[#allocation2 + $0x6f] sm:$0xff]  ;;  %v2258_v63 = vmul.f32 %v2200_v28, %v431_v45  ;;  %v566_v0 = vmul.f32 %v2125_v5, %v529_v38  ;;  %v433_v9 = vld [vmem:[#allocation2 + $0x87] sm:$0xff]  ;;  %v2262_v11 = vmul.f32 %v2205_v29, %v532_v50 }
  0x31   : > { %406 = vst.msk [vmem:[#allocation2 + $0x128] sm:$0xff] %vm315_vm0, %v374_v27  ;;  %407 = vst.msk [vmem:[#allocation2 + $0x130] sm:$0xff] %vm315_vm0, %v375_v32  ;;  %v534_v10 = vld [vmem:[#allocation2 + $0x88] sm:$0xff]  ;;  %v2265_v12 = vmul.f32 %v2183_v23, %v430_v43  ;;  %v466_v19 = vmul.f32 %v2120_v4, %v429_v39  ;;  %v567_v20 = vmul.f32 %v2125_v5, %v530_v40  ;;  %v535_v30 = vld [vmem:[#allocation2 + $0x90] sm:$0xff] }
  0x32   : > { %408 = vst.msk [vmem:[#allocation2 + $0x148] sm:$0xff] %vm315_vm0, %v376_v33  ;;  %409 = vst.msk [vmem:[#allocation2 + $0x150] sm:$0xff] %vm315_vm0, %v377_v34  ;;  %v434_v21 = vld [vmem:[#allocation2 + $0x8f] sm:$0xff]  ;;  %v2270_v22 = vmul.f32 %v2188_v24, %v531_v44  ;;  %v2273_v25 = vmul.f32 %v2200_v28, %v432_v55  ;;  %v2276_v26 = vmul.f32 %v2205_v29, %v533_v56  ;;  %v2288_v35 = vld [vmem:[#allocation2 + $0xa7] sm:$0xff] }
  0x33   : > { %v2279_v27 = vmul.f32 %v2183_v23, %v431_v45  ;;  %v2281_v31 = vadd.f32 %v566_v0, %v465_v60  ;;  %v2284_v32 = vmul.f32 %v2188_v24, %v532_v50  ;;  %v467_v33 = vmul.f32 %v2120_v4, %v430_v43  ;;  %v2290_v36 = vld [vmem:[#allocation2 + $0xa8] sm:$0xff]  ;;  %v2313_v0 = vld [vmem:[#allocation2 + $0xb0] sm:$0xff]  ;;  %410 = vst.msk [vmem:[#allocation2 + $0x168] sm:$0xff] %vm315_vm0, %v378_v14 }
  0x34   : > { %v568_v34 = vmul.f32 %v2125_v5, %v531_v44  ;;  %v2292_v37 = vadd.f32 %v567_v20, %v466_v19  ;;  %v2295_v38 = vmul.f32 %v2200_v28, %v433_v9  ;;  %v2298_v39 = vmul.f32 %v2205_v29, %v534_v10  ;;  %v2311_v60 = vld [vmem:[#allocation2 + $0xaf] sm:$0xff]  ;;  %3319 = vst [vmem:[#allocation21_spill] sm:$0xff] %v2313_v0  ;;  %v2322_v17 = vld [vmem:[#allocation2 + $0xc7] sm:$0xff] }
  0x35   : > { %v468_v40 = vmul.f32 %v2120_v4, %v431_v45  ;;  %v2302_v42 = vmul.f32 %v2183_v23, %v432_v55  ;;  %v2305_v43 = vmul.f32 %v2188_v24, %v533_v56  ;;  %v2308_v44 = vmul.f32 %v2200_v28, %v434_v21  ;;  %3318 = vst [vmem:[#allocation20_spill] sm:$0xff] %v2311_v60  ;;  %v2324_v16 = vld [vmem:[#allocation2 + $0xc8] sm:$0xff] }
  0x36   : > { %3317 = vst [vmem:[#allocation19_spill] sm:$0xff] %v2298_v39  ;;  %v569_v49 = vmul.f32 %v2125_v5, %v532_v50  ;;  %v2315_v19 = vadd.f32 %v568_v34, %v467_v33  ;;  %v2318_v45 = vmul.f32 %v2205_v29, %v535_v30  ;;  %v469_v20 = vmul.f32 %v2120_v4, %v432_v55  ;;  %v2326_v50 = vld [vmem:[#allocation2 + $0xcf] sm:$0xff] }
  0x37   : > { %v570_v18 = vmul.f32 %v2125_v5, %v533_v56  ;;  %3321 = vst [vmem:[#allocation23_spill] sm:$0xff] %v2322_v17  ;;  %3322 = vst [vmem:[#allocation24_spill] sm:$0xff] %v2326_v50  ;;  %v2329_v15 = vmul.f32 %v2183_v23, %v433_v9  ;;  %v2332_v33 = vmul.f32 %v2188_v24, %v534_v10  ;;  %v2342_v34 = vld [vmem:[#allocation2 + $0xd0] sm:$0xff] }
  0x38   : > { %3320 = vst [vmem:[#allocation22_spill] sm:$0xff] %v2318_v45  ;;  %v2336_v55 = vmul.f32 %v2200_v28, %v2288_v35  ;;  %v2340_v56 = vmul.f32 %v2205_v29, %v2290_v36  ;;  %3325 = vst [vmem:[#allocation27_spill] sm:$0xff] %v2342_v34  ;;  %v2351_v7 = vadd.f32 %v569_v49, %v468_v40  ;;  %v2366_v40 = vld [vmem:[%s3269_s1 + $0x6] ss:$0 sm:$0xff]  ;;  %v388_v45 = vld [vmem:[%s2106_s25 + $0xf0] sm:$0xff] }
  0x39   : > { %v2354_v6 = vmul.f32 %v2183_v23, %v434_v21  ;;  %v470_v3 = vmul.f32 %v2120_v4, %v433_v9  ;;  %v571_v2 = vmul.f32 %v2125_v5, %v534_v10  ;;  %411 = vst.msk [vmem:[#allocation2 + $0x170] sm:$0xff] %vm315_vm0, %v379_v13  ;;  %v2371_v9 = vld [vmem:[%s3269_s1 + $0xa] ss:$0 sm:$0xff]  ;;  %v2373_v10 = vadd.f32 %v570_v18, %v469_v20  ;;  %v384_v20 = vld [vmem:[%s2106_s25 + $0xd0] sm:$0xff] }
  0x3a   : > { %3323 = vst [vmem:[#allocation25_spill] sm:$0xff] %v2336_v55  ;;  %3324 = vst [vmem:[#allocation26_spill] sm:$0xff] %v2340_v56  ;;  %v381_v56 = vld [vmem:[%s2106_s25 + $0xb8] sm:$0xff]  ;;  %v382_v55 = vld [vmem:[%s2106_s25 + $0xc0] sm:$0xff]  ;;  %v2376_v14 = vmul.f32 %v2188_v24, %v535_v30  ;;  %v2380_v13 = vmul.f32 %v2200_v28, %v2311_v60  ;;  %v2384_v49 = vmul.f32 %v2205_v29, %v2313_v0 }
  0x3b   : > { %3326 = vst [vmem:[#allocation28_spill] sm:$0xff] %v2354_v6  ;;  %412 = vst.msk [vmem:[#allocation2 + $0x188] sm:$0xff] %vm315_vm0, %v380_v1  ;;  %v383_v18 = vld [vmem:[%s2106_s25 + $0xc8] sm:$0xff]  ;;  %v2394_v6 = vmul.f32 %v2183_v23, %v2288_v35  ;;  %v572_v1 = vmul.f32 %v2125_v5, %v535_v30  ;;  %v2408_v39 = vadd.f32 %v571_v2, %v470_v3  ;;  %v389_v2 = vld [vmem:[%s2106_s25 + $0xf8] sm:$0xff] }
  0x3c   : > { %3327 = vst [vmem:[#allocation29_spill] sm:$0xff] %v2376_v14  ;;  %3328 = vst [vmem:[#allocation30_spill] sm:$0xff] %v2380_v13  ;;  %v385_v14 = vld [vmem:[%s2106_s25 + $0xd8] sm:$0xff]  ;;  %v2398_v13 = vmul.f32 %v2188_v24, %v2290_v36  ;;  %v2420_v30 = vmul.f32 %v2183_v23, %v2311_v60  ;;  %v627_v3 = vld [vmem:[#allocation2 + $0x9] sm:$0xff] }
  0x3d   : > { %3329 = vst [vmem:[#allocation31_spill] sm:$0xff] %v2384_v49  ;;  %413 = vst.msk [vmem:[#allocation2 + $0x190] sm:$0xff] %vm315_vm0, %v381_v56  ;;  %v471_v49 = vmul.f32 %v2120_v4, %v434_v21  ;;  %v387_v56 = vld [vmem:[%s2106_s25 + $0xe8] sm:$0xff]  ;;  %v2416_v21 = vmul.f32 %v2205_v29, %v2324_v16 }
  0x3e   : > { %414 = vst.msk [vmem:[#allocation2 + $0x1a8] sm:$0xff] %vm315_vm0, %v382_v55  ;;  %3330 = vst [vmem:[#allocation32_spill] sm:$0xff] %v2394_v6  ;;  %v386_v55 = vld [vmem:[%s2106_s25 + $0xe0] sm:$0xff]  ;;  %v2412_v6 = vmul.f32 %v2200_v28, %v2322_v17 }
  0x3f   : > { %3331 = vst [vmem:[#allocation33_spill] sm:$0xff] %v2398_v13  ;;  %415 = vst.msk [vmem:[#allocation2 + $0x1b0] sm:$0xff] %vm315_vm0, %v383_v18  ;;  %v2428_v18 = vmul.f32 %v2188_v24, %v2313_v0  ;;  %v932_v0 = vld [vmem:[#allocation2 + $0x31] sm:$0xff]  ;;  %v2445_v60 = vadd.f32 %v572_v1, %v471_v49 }
  0x40   : > { %416 = vst.msk [vmem:[#allocation2 + $0x1c8] sm:$0xff] %vm315_vm0, %v384_v20  ;;  %417 = vst.msk [vmem:[#allocation2 + $0x1d0] sm:$0xff] %vm315_vm0, %v385_v14  ;;  %v931_v14 = vld [vmem:[#allocation2 + $0x29] sm:$0xff]  ;;  %v2432_v20 = vmul.f32 %v2200_v28, %v2326_v50  ;;  %v969_v49 = vmul.f32 %v2366_v40, %v932_v0  ;;  %v667_v13 = vmul.f32 %v2349_v8, %v932_v0 }
  0x41   : > { %3332 = vst [vmem:[#allocation34_spill] sm:$0xff] %v2412_v6  ;;  %3333 = vst [vmem:[#allocation35_spill] sm:$0xff] %v2416_v21  ;;  %v2436_v21 = vmul.f32 %v2205_v29, %v2342_v34  ;;  %v628_v6 = vld [vmem:[#allocation2 + $0x11] sm:$0xff]  ;;  %v968_v34 = vmul.f32 %v2366_v40, %v931_v14  ;;  %v1238_v50 = vld [vmem:[#allocation2 + $0x69] sm:$0xff] }
  0x42   : > { %418 = vst.msk [vmem:[#allocation2 + $0x1e8] sm:$0xff] %vm315_vm0, %v386_v55  ;;  %419 = vst.msk [vmem:[#allocation2 + $0x1f0] sm:$0xff] %vm315_vm0, %v387_v56  ;;  %v2440_v55 = vmul.f32 %v2120_v4, %v2288_v35  ;;  %v1236_v56 = vld [vmem:[#allocation2 + $0x49] sm:$0xff] }
  0x43   : > { %420 = vst.msk [vmem:[#allocation2 + $0x208] sm:$0xff] %vm315_vm0, %v388_v45  ;;  %3334 = vst [vmem:[#allocation36_spill] sm:$0xff] %v2428_v18  ;;  %v664_v45 = vmul.f32 %v2349_v8, %v627_v3  ;;  %v666_v18 = vmul.f32 %v2349_v8, %v931_v14  ;;  %v1273_v35 = vmul.f32 %v2371_v9, %v1236_v56 }
  0x44   : > { %3335 = vst [vmem:[#allocation37_spill] sm:$0xff] %v2432_v20  ;;  %3336 = vst [vmem:[#allocation38_spill] sm:$0xff] %v2436_v21  ;;  %v2449_v20 = vmul.f32 %v2125_v5, %v2290_v36  ;;  %v665_v21 = vmul.f32 %v2349_v8, %v628_v6  ;;  %v2456_v3 = vmul.f32 %v2183_v23, %v2322_v17  ;;  %v1239_v5 = vld [vmem:[#allocation2 + $0x71] sm:$0xff] }
  0x45   : > { %421 = vst.msk [vmem:[#allocation2 + $0x210] sm:$0xff] %vm315_vm0, %v389_v2  ;;  %v1237_v2 = vld [vmem:[#allocation2 + $0x51] sm:$0xff]  ;;  %v696_v29 = vadd.f32 %v664_v45, %v2218_v41  ;;  %v698_v1 = vadd.f32 %v666_v18, %v2252_v61  ;;  %v970_v36 = vmul.f32 %v2366_v40, %v1236_v56  ;;  %v1275_v6 = vmul.f32 %v2371_v9, %v1238_v50  ;;  %v2470_v61 = vld [vmem:[#allocation2 + $0x89] sm:$0xff] }
  0x46   : > { %3337 = vst [vmem:[#allocation39_spill] sm:$0xff] %v2456_v3  ;;  %v697_v14 = vadd.f32 %v665_v21, %v2227_v48  ;;  %v1274_v4 = vmul.f32 %v2371_v9, %v1237_v2  ;;  %v971_v41 = vmul.f32 %v2366_v40, %v1237_v2  ;;  %v668_v45 = vmul.f32 %v2349_v8, %v1236_v56 }
  0x47   : > { %v798_v17 = vadd.f32 %v2222_v46, %v696_v29  ;;  %v800_v23 = vadd.f32 %v2249_v59, %v698_v1  ;;  %v699_v48 = vadd.f32 %v667_v13, %v2281_v31  ;;  %v1276_v21 = vmul.f32 %v2371_v9, %v1239_v5 }
  0x48   : > { %v799_v18 = vadd.f32 %v2237_v53, %v697_v14  ;;  %v669_v3 = vmul.f32 %v2349_v8, %v1237_v2  ;;  %v700_v46 = vadd.f32 %v668_v45, %v2292_v37  ;;  %v972_v59 = vmul.f32 %v2366_v40, %v1238_v50 }
  0x49   : > { %v899_v0 = vadd.f32 %v2225_v47, %v798_v17  ;;  %v901_v29 = vadd.f32 %v2255_v62, %v800_v23  ;;  %v801_v1 = vadd.f32 %v2265_v12, %v699_v48  ;;  %v1277_v53 = vmul.f32 %v2371_v9, %v2470_v61 }
  0x4a   : > { %v900_v56 = vadd.f32 %v2240_v54, %v799_v18  ;;  %v701_v31 = vadd.f32 %v669_v3, %v2315_v19  ;;  %v802_v2 = vadd.f32 %v2279_v27, %v700_v46  ;;  %v670_v17 = vmul.f32 %v2349_v8, %v1238_v50 }
  0x4b   : > { %v1000_v13 = vadd.f32 %v968_v34, %v899_v0  ;;  %v1002_v14 = vadd.f32 %v970_v36, %v901_v29  ;;  %v902_v47 = vadd.f32 %v2270_v22, %v801_v1  ;;  %v973_v54 = vmul.f32 %v2366_v40, %v1239_v5  ;;  %v1241_v0 = vld [vmem:[#allocation2 + $0x91] sm:$0xff] }
  0x4c   : > { %v1001_v23 = vadd.f32 %v969_v49, %v900_v56  ;;  %v803_v62 = vadd.f32 %v2302_v42, %v701_v31  ;;  %v903_v45 = vadd.f32 %v2284_v32, %v802_v2  ;;  %v702_v19 = vadd.f32 %v670_v17, %v2351_v7  ;;  %v1242_v31 = vld [vmem:[#allocation2 + $0xa9] sm:$0xff] }
  0x4d   : > { %v1103_v12 = vadd.f32 %v2231_v51, %v1000_v13  ;;  %v1105_v37 = vadd.f32 %v2258_v63, %v1002_v14  ;;  %v1003_v27 = vadd.f32 %v971_v41, %v902_v47  ;;  %v974_v22 = vmul.f32 %v2366_v40, %v2470_v61  ;;  %v2504_v63 = vld [vmem:[%s3270_s2] ss:$0 sm:$0xff]  ;;  %v3341_v47 = vld [vmem:[#allocation25_spill] sm:$0xff] }
  0x4e   : > { %v1104_v34 = vadd.f32 %v2243_v57, %v1001_v23  ;;  %v904_v50 = vadd.f32 %v2305_v43, %v803_v62  ;;  %v1004_v49 = vadd.f32 %v972_v59, %v903_v45  ;;  %v804_v51 = vadd.f32 %v2329_v15, %v702_v19 }
  0x4f   : > { %v1204_v42 = vadd.f32 %v2234_v52, %v1103_v12  ;;  %v1206_v3 = vadd.f32 %v2262_v11, %v1105_v37  ;;  %v1106_v57 = vadd.f32 %v2273_v25, %v1003_v27  ;;  %v671_v43 = vmul.f32 %v2349_v8, %v1239_v5 }
  0x50   : > { %v1205_v7 = vadd.f32 %v2246_v58, %v1104_v34  ;;  %v1005_v32 = vadd.f32 %v973_v54, %v904_v50  ;;  %v1107_v52 = vadd.f32 %v2295_v38, %v1004_v49  ;;  %v905_v11 = vadd.f32 %v2332_v33, %v804_v51  ;;  %v2514_v58 = vld [vmem:[#allocation2 + $0xe7] sm:$0xff]  ;;  %v3342_v54 = vld [vmem:[#allocation29_spill] sm:$0xff] }
  0x51   : > { %v1305_v36 = vadd.f32 %v1273_v35, %v1204_v42  ;;  %v1307_v41 = vadd.f32 %v1275_v6, %v1206_v3  ;;  %v1207_v15 = vadd.f32 %v2276_v26, %v1106_v57  ;;  %v703_v29 = vadd.f32 %v671_v43, %v2373_v10  ;;  %v3338_v35 = vld [vmem:[#allocation19_spill] sm:$0xff]  ;;  %v3340_v26 = vld [vmem:[#allocation28_spill] sm:$0xff] }
  0x52   : > { %v1306_v18 = vadd.f32 %v1274_v4, %v1205_v7  ;;  %v1108_v48 = vadd.f32 %v2308_v44, %v1005_v32  ;;  %v1208_v6 = vadd.f32 %v3338_v35, %v1107_v52  ;;  %v1006_v46 = vadd.f32 %v974_v22, %v905_v11  ;;  %v3339_v4 = vld [vmem:[#allocation22_spill] sm:$0xff] }
  0x53   : > { %v1343_v25 = vadd.f32 %v2504_v63, %v1305_v36  ;;  %v1345_v5 = vadd.f32 %v2504_v63, %v1307_v41  ;;  %v1308_v33 = vadd.f32 %v1276_v21, %v1207_v15  ;;  %v805_v56 = vadd.f32 %v3340_v26, %v703_v29  ;;  %v1243_v32 = vld [vmem:[#allocation2 + $0xb1] sm:$0xff]  ;;  %v2549_v15 = vld [vmem:[#allocation2 + $0xc9] sm:$0xff] }
  0x54   : > { %v1344_v38 = vadd.f32 %v2504_v63, %v1306_v18  ;;  %v1209_v59 = vadd.f32 %v3339_v4, %v1108_v48  ;;  %v1278_v10 = vmul.f32 %v2371_v9, %v1241_v0  ;;  %v2525_v13 = vmul.f32 %v2188_v24, %v2324_v16  ;;  %v3344_v11 = vld [vmem:[#allocation30_spill] sm:$0xff] }
  0x55   : > { %v1407_v44 = vmul.f32 0.70710677, %v1343_v25  ;;  %v1409_v1 = vmul.f32 0.70710677, %v1345_v5  ;;  %v1346_v2 = vadd.f32 %v2504_v63, %v1308_v33  ;;  %v1309_v17 = vadd.f32 %v1277_v53, %v1208_v6  ;;  %v3343_v53 = vld [vmem:[#allocation26_spill] sm:$0xff] }
  0x56   : > { %v1408_v14 = vmul.f32 0.70710677, %v1344_v38  ;;  %v2530_v21 = vmul.f32 %v2200_v28, %v2514_v58  ;;  %v1310_v23 = vadd.f32 %v1278_v10, %v1209_v59  ;;  %v1109_v62 = vadd.f32 %v3341_v47, %v1006_v46  ;;  %v2556_v35 = vld [vmem:[#allocation2 + $0xd1] sm:$0xff]  ;;  %v3345_v46 = vld [vmem:[#allocation31_spill] sm:$0xff]  ;;  %v3346_v59 = vld [vmem:[#allocation32_spill] sm:$0xff] }
  0x57   : > { %1902 = verf.f32 %v1407_v44  ;;  %v906_v12 = vadd.f32 %v3342_v54, %v805_v56  ;;  %v1410_v37 = vmul.f32 0.70710677, %v1346_v2  ;;  %v1347_v45 = vadd.f32 %v2504_v63, %v1309_v17  ;;  %v2568_v44 = vld [vmem:[#allocation2 + $0xe8] sm:$0xff]  ;;  %v3347_v10 = vld [vmem:[#allocation33_spill] sm:$0xff]  ;;  %v3349_v17 = vld [vmem:[#allocation6_spill] sm:$0xff] }
  0x58   : > { %1904 = verf.f32 %v1408_v14  ;;  %v1279_v19 = vmul.f32 %v2371_v9, %v1242_v31  ;;  %v1348_v34 = vadd.f32 %v2504_v63, %v1310_v23  ;;  %v1210_v27 = vadd.f32 %v3343_v53, %v1109_v62  ;;  %v3350_v47 = vld [vmem:[#allocation21_spill] sm:$0xff]  ;;  %v3351_v62 = vld [vmem:[#allocation7_spill] sm:$0xff] }
  0x59   : > { %1906 = verf.f32 %v1409_v1  ;;  %v975_v50 = vmul.f32 %v2366_v40, %v1241_v0  ;;  %v1375_v22 = vmul.f32 0.5, %v1343_v25  ;;  %v2539_v42 = vmul.f32 0.5, %v1345_v5  ;;  %v3353_v53 = vld [vmem:[#allocation39_spill] sm:$0xff] }
  0x5a   : > { %1908 = verf.f32 %v1410_v37  ;;  %v1411_v3 = vmul.f32 0.70710677, %v1347_v45  ;;  %v1376_v49 = vmul.f32 0.5, %v1344_v38  ;;  %v1412_v51 = vmul.f32 0.70710677, %v1348_v34  ;;  %v3352_v37 = vld [vmem:[#allocation36_spill] sm:$0xff] }
  0x5b   : > { %v1311_v7 = vadd.f32 %v1279_v19, %v1210_v27  ;;  %v1007_v57 = vadd.f32 %v975_v50, %v906_v12  ;;  %v2541_v43 = vmul.f32 0.5, %v1346_v2  ;;  %v2543_v36 = vmul.f32 0.5, %v1347_v45  ;;  %v3348_v2 = vld [vmem:[#allocation20_spill] sm:$0xff]  ;;  %v3354_v50 = vld [vmem:[#allocation18_spill] sm:$0xff] }
  0x5c   : > { %1910 = verf.f32 %v1411_v3  ;;  %v672_v41 = vmul.f32 %v2349_v8, %v2470_v61  ;;  %v673_v48 = vmul.f32 %v2349_v8, %v1241_v0  ;;  %v2552_v29 = vmul.f32 0.5, %v1348_v34 }
  0x5d   : > { %1912 = verf.f32 %v1412_v51  ;;  %v1349_v52 = vadd.f32 %v2504_v63, %v1311_v7  ;;  %v1110_v18 = vadd.f32 %v3344_v11, %v1007_v57  ;;  %v1280_v25 = vmul.f32 %v2371_v9, %v1243_v32 }
  0x5e   : > { %v704_v5 = vadd.f32 %v672_v41, %v2408_v39  ;;  %v605_v61 = vadd.f32 %v2449_v20, %v2440_v55  ;;  %v976_v33 = vmul.f32 %v2366_v40, %v1242_v31  ;;  %v705_v4 = vadd.f32 %v673_v48, %v2445_v60  ;;  %v2596_v48 = vld [vmem:[%s3271_s3] ss:$0 sm:$0xff] }
  0x5f   : > { %v1413_v6 = vmul.f32 0.70710677, %v1349_v52  ;;  %v1211_v38 = vadd.f32 %v3345_v46, %v1110_v18  ;;  %v1281_v26 = vmul.f32 %v2371_v9, %v2549_v15  ;;  %v977_v56 = vmul.f32 %v2366_v40, %v1243_v32  ;;  %v3356_v46 = vld [vmem:[#allocation24_spill] sm:$0xff] }
  0x60   : > { %v806_v0 = vadd.f32 %v3346_v59, %v704_v5  ;;  %v674_v39 = vmul.f32 %v2349_v8, %v1242_v31  ;;  %v807_v55 = vadd.f32 %v2420_v30, %v705_v4  ;;  %v1282_v1 = vmul.f32 %v2371_v9, %v2556_v35  ;;  %v3355_v5 = vld [vmem:[#allocation34_spill] sm:$0xff] }
  0x61   : > { %1914 = verf.f32 %v1413_v6  ;;  %v1312_v20 = vadd.f32 %v1280_v25, %v1211_v38  ;;  %v473_v23 = vmul.f32 %v3349_v17, %v3348_v2  ;;  %v574_v54 = vmul.f32 %v3351_v62, %v3350_v47  ;;  %v3357_v38 = vld [vmem:[#allocation17_spill] sm:$0xff] }
  0x62   : > { %v907_v60 = vadd.f32 %v3347_v10, %v806_v0  ;;  %v706_v14 = vadd.f32 %v674_v39, %v605_v61  ;;  %v2578_v12 = vmul.f32 0.5, %v1349_v52  ;;  %v908_v45 = vadd.f32 %v3352_v37, %v807_v55  ;;  %v2606_v39 = vld [vmem:[%s3272_s4] ss:$0 sm:$0xff] }
  0x63   : > { %v2581_v31 = vadd.f32 %v2504_v63, %v1312_v20  ;;  %v978_v30 = vmul.f32 %v2366_v40, %v2549_v15  ;;  %v2589_v3 = vmul.f32 %v3354_v50, %v2568_v44  ;;  %v606_v51 = vadd.f32 %v574_v54, %v473_v23  ;;  %v3359_v10 = vld [vmem:[#allocation35_spill] sm:$0xff]  ;;  %v3360_v23 = vld [vmem:[#allocation38_spill] sm:$0xff] }
  0x64   : > { %v1903_v19 = vpop.eup %1902  ;;  %v1008_v34 = vadd.f32 %v976_v33, %v907_v60  ;;  %v808_v27 = vadd.f32 %v3353_v53, %v706_v14  ;;  %v1009_v52 = vadd.f32 %v977_v56, %v908_v45  ;;  %v675_v11 = vmul.f32 %v2349_v8, %v1243_v32  ;;  %v3358_v56 = vld [vmem:[#allocation37_spill] sm:$0xff] }
  0x65   : > { %v1905_v7 = vpop.eup %1904  ;;  %v1471_v57 = vadd.f32 1.0, %v1903_v19  ;;  %v1414_v41 = vmul.f32 0.70710677, %v2581_v31  ;;  %v777_v33 = vmul.f32 %v3357_v38, %v3356_v46 }
  0x66   : > { %v1907_v18 = vpop.eup %1906  ;;  %v1472_v25 = vadd.f32 1.0, %v1905_v7  ;;  %v1111_v61 = vadd.f32 %v3355_v5, %v1008_v34  ;;  %v909_v6 = vadd.f32 %v2525_v13, %v808_v27  ;;  %v1112_v32 = vadd.f32 %v3358_v56, %v1009_v52 }
  0x67   : > { %v1909_v4 = vpop.eup %1908  ;;  %v1503_v59 = vmul.f32 %v1471_v57, %v1375_v22  ;;  %v1473_v0 = vadd.f32 1.0, %v1907_v18  ;;  %1916 = verf.f32 %v1414_v41  ;;  %v707_v13 = vadd.f32 %v675_v11, %v606_v51  ;;  %v3361_v57 = vld [vmem:[#allocation3_spill] sm:$0xff] }
  0x68   : > { %v1504_v20 = vmul.f32 %v1472_v25, %v1376_v49  ;;  %v1474_v55 = vadd.f32 1.0, %v1909_v4  ;;  %v1212_v60 = vadd.f32 %v3359_v10, %v1111_v61  ;;  %v1213_v47 = vadd.f32 %v3360_v23, %v1112_v32  ;;  %v3362_v25 = vld [vmem:[#allocation4_spill] sm:$0xff]  ;;  %v3363_v4 = vld [vmem:[#allocation5_spill] sm:$0xff] }
  0x69   : > { %v1911_v14 = vpop.eup %1910  ;;  %v1573_v2 = vmul.f32 %v2596_v48, %v1503_v59  ;;  %v1505_v22 = vmul.f32 %v1473_v0, %v2539_v42  ;;  %v1010_v54 = vadd.f32 %v978_v30, %v909_v6  ;;  %v3364_v32 = vld [vmem:[#allocation8_spill] sm:$0xff] }
  0x6a   : > { %v1913_v37 = vpop.eup %1912  ;;  %v1574_v45 = vmul.f32 %v2596_v48, %v1504_v20  ;;  %v1506_v19 = vmul.f32 %v1474_v55, %v2541_v43  ;;  %v1475_v34 = vadd.f32 1.0, %v1911_v14  ;;  %v1313_v49 = vadd.f32 %v1281_v26, %v1212_v60  ;;  %v2642_v60 = vld [vmem:[#allocation2 + $0xe9] sm:$0xff]  ;;  %v3365_v14 = vld [vmem:[#allocation27_spill] sm:$0xff] }
  0x6b   : > { %v1611_v53 = vadd.f32 %v2606_v39, %v1573_v2  ;;  %v1575_v27 = vmul.f32 %v2596_v48, %v1505_v22  ;;  %v1476_v51 = vadd.f32 1.0, %v1913_v37  ;;  %v1314_v7 = vadd.f32 %v1282_v1, %v1213_v47  ;;  %v3366_v47 = vld [vmem:[#allocation9_spill] sm:$0xff] }
  0x6c   : > { %v1612_v42 = vadd.f32 %v2606_v39, %v1574_v45  ;;  %v1576_v30 = vmul.f32 %v2596_v48, %v1506_v19  ;;  %v1507_v43 = vmul.f32 %v1475_v34, %v2543_v36  ;;  %v1351_v26 = vadd.f32 %v2504_v63, %v1313_v49  ;;  %v2658_v34 = vld [vmem:[#allocation2 + $0xf0] sm:$0xff]  ;;  %v3367_v49 = vld [vmem:[#allocation10_spill] sm:$0xff] }
  0x6d   : > { %v1643_v41 = vadd.f32 %v1611_v53, %v3361_v57  ;;  %v1613_v1 = vadd.f32 %v2606_v39, %v1575_v27  ;;  %v1508_v52 = vmul.f32 %v1476_v51, %v2552_v29  ;;  %v1352_v11 = vadd.f32 %v2504_v63, %v1314_v7 }
  0x6e   : > { %v1915_v18 = vpop.eup %1914  ;;  %v1644_v5 = vadd.f32 %v1612_v42, %v3362_v25  ;;  %v1614_v61 = vadd.f32 %v2606_v39, %v1576_v30  ;;  %v1577_v6 = vmul.f32 %v2596_v48, %v1507_v43  ;;  %v809_v36 = vadd.f32 %v777_v33, %v707_v13  ;;  %v2646_v13 = vld [vmem:[#allocation2 + $0xef] sm:$0xff]  ;;  %v3368_v30 = vld [vmem:[#allocation23_spill] sm:$0xff] }
  0x6f   : > { %1675 = vst.msk [vmem:[%s2621_s8] sm:$0xff] %vm315_vm0, %v1643_v41  ;;  %v1645_v59 = vadd.f32 %v1613_v1, %v3363_v4  ;;  %v1578_v0 = vmul.f32 %v2596_v48, %v1508_v52  ;;  %v1477_v56 = vadd.f32 1.0, %v1915_v18  ;;  %v1415_v29 = vmul.f32 0.70710677, %v1351_v26  ;;  %v2675_v1 = vld [vmem:[#allocation2 + $0xf1] sm:$0xff] }
  0x70   : > { %1676 = vst.msk [vmem:[%s2621_s8 + $0x8] sm:$0xff] %vm315_vm0, %v1644_v5  ;;  %v1646_v20 = vadd.f32 %v1614_v61, %v3364_v32  ;;  %v1615_v55 = vadd.f32 %v2606_v39, %v1577_v6  ;;  %v1416_v10 = vmul.f32 0.70710677, %v1352_v11  ;;  %v878_v33 = vmul.f32 %v2188_v24, %v3365_v14  ;;  %v740_v5 = vld [vmem:[#allocation2 + $0xe7] sm:$0xff] }
  0x71   : > { %1677 = vst.msk [vmem:[%s2621_s8 + $0x10] sm:$0xff] %vm315_vm0, %v1645_v59  ;;  %v1616_v2 = vadd.f32 %v2606_v39, %v1578_v0  ;;  %v1509_v22 = vmul.f32 %v1477_v56, %v2578_v12  ;;  %1918 = verf.f32 %v1415_v29  ;;  %v1113_v23 = vadd.f32 %v2530_v21, %v1010_v54  ;;  %v3369_v61 = vld [vmem:[#allocation11_spill] sm:$0xff]  ;;  %v842_v0 = vld [vmem:[#allocation2 + $0xe8] sm:$0xff] }
  0x72   : > { %1678 = vst.msk [vmem:[%s2621_s8 + $0x18] sm:$0xff] %vm315_vm0, %v1646_v20  ;;  %v1647_v37 = vadd.f32 %v1615_v55, %v3366_v47  ;;  %1920 = verf.f32 %v1416_v10  ;;  %v910_v45 = vadd.f32 %v878_v33, %v809_v36  ;;  %v979_v19 = vmul.f32 %v2366_v40, %v2556_v35  ;;  %v1045_v33 = vld [vmem:[#allocation2 + $0x107] sm:$0xff] }
  0x73   : > { %v1648_v53 = vadd.f32 %v1616_v2, %v3367_v49  ;;  %v1579_v27 = vmul.f32 %v2596_v48, %v1509_v22  ;;  %v1214_v12 = vadd.f32 %v2589_v3, %v1113_v23  ;;  %v1283_v21 = vmul.f32 %v2371_v9, %v2642_v60  ;;  %v1147_v23 = vld [vmem:[#allocation2 + $0x108] sm:$0xff] }
  0x74   : > { %v1917_v54 = vpop.eup %1916  ;;  %1679 = vst.msk [vmem:[%s2621_s8 + $0x20] sm:$0xff] %vm315_vm0, %v1647_v37  ;;  %v1382_v51 = vmul.f32 0.5, %v2581_v31  ;;  %v1011_v7 = vadd.f32 %v979_v19, %v910_v45  ;;  %v1082_v42 = vmul.f32 %v2200_v28, %v2646_v13  ;;  %v474_v43 = vmul.f32 %v3349_v17, %v3368_v30  ;;  %v2699_v19 = vld [vmem:[#allocation2 + $0x109] sm:$0xff] }
  0x75   : > { %1680 = vst.msk [vmem:[%s2621_s8 + $0x28] sm:$0xff] %vm315_vm0, %v1648_v53  ;;  %v1617_v57 = vadd.f32 %v2606_v39, %v1579_v27  ;;  %v1478_v3 = vadd.f32 1.0, %v1917_v54  ;;  %v1315_v41 = vadd.f32 %v1283_v21, %v1214_v12  ;;  %v575_v52 = vmul.f32 %v3351_v62, %v2324_v16  ;;  %v741_v49 = vld [vmem:[#allocation2 + $0xef] sm:$0xff] }
  0x76   : > { %v1114_v31 = vadd.f32 %v1082_v42, %v1011_v7  ;;  %v1183_v18 = vmul.f32 %v3354_v50, %v2658_v34  ;;  %v676_v25 = vmul.f32 %v2349_v8, %v2549_v15  ;;  %v1383_v56 = vmul.f32 0.5, %v1351_v26  ;;  %v843_v12 = vld [vmem:[#allocation2 + $0xf0] sm:$0xff]  ;;  %v3370_v21 = vld [vmem:[#allocation12_spill] sm:$0xff] }
  0x77   : > { %v1649_v6 = vadd.f32 %v1617_v57, %v3369_v61  ;;  %v1510_v36 = vmul.f32 %v1478_v3, %v1382_v51  ;;  %v1353_v4 = vadd.f32 %v2504_v63, %v1315_v41  ;;  %v607_v59 = vadd.f32 %v575_v52, %v474_v43  ;;  %v1046_v52 = vld [vmem:[#allocation2 + $0x10f] sm:$0xff] }
  0x78   : > { %v1384_v29 = vmul.f32 0.5, %v1352_v11  ;;  %v1215_v32 = vadd.f32 %v1183_v18, %v1114_v31  ;;  %v1284_v16 = vmul.f32 %v2371_v9, %v2675_v1  ;;  %v778_v10 = vmul.f32 %v3357_v38, %v740_v5 }
  0x79   : > { %1681 = vst.msk [vmem:[%s2621_s8 + $0x30] sm:$0xff] %vm315_vm0, %v1649_v6  ;;  %v1580_v20 = vmul.f32 %v2596_v48, %v1510_v36  ;;  %v1417_v55 = vmul.f32 0.70710677, %v1353_v4  ;;  %v708_v15 = vadd.f32 %v676_v25, %v607_v59  ;;  %v879_v22 = vmul.f32 %v2188_v24, %v842_v0  ;;  %v1148_v36 = vld [vmem:[#allocation2 + $0x110] sm:$0xff] }
  0x7a   : > { %v1316_v2 = vadd.f32 %v1284_v16, %v1215_v32  ;;  %v475_v26 = vmul.f32 %v3349_v17, %v3356_v46  ;;  %v576_v11 = vmul.f32 %v3351_v62, %v3365_v14  ;;  %v980_v45 = vmul.f32 %v2366_v40, %v2642_v60 }
  0x7b   : > { %v1618_v47 = vadd.f32 %v2606_v39, %v1580_v20  ;;  %1922 = verf.f32 %v1417_v55  ;;  %v810_v37 = vadd.f32 %v778_v10, %v708_v15  ;;  %v1083_v27 = vmul.f32 %v2200_v28, %v1045_v33 }
  0x7c   : > { %v2702_v53 = vadd.f32 %v2504_v63, %v1316_v2  ;;  %v608_v46 = vadd.f32 %v576_v11, %v475_v26  ;;  %v677_v14 = vmul.f32 %v2349_v8, %v2556_v35  ;;  %v2708_v51 = vmul.f32 0.5, %v1353_v4  ;;  %v2720_v4 = vld [vmem:[#allocation2 + $0x111] sm:$0xff] }
  0x7d   : > { %v1650_v54 = vadd.f32 %v1618_v47, %v3370_v21  ;;  %v911_v7 = vadd.f32 %v879_v22, %v810_v37  ;;  %v1184_v42 = vmul.f32 %v3354_v50, %v1147_v23  ;;  %v1285_v57 = vmul.f32 %v2371_v9, %v2699_v19 }
  0x7e   : > { %v1919_v30 = vpop.eup %1918  ;;  %v1418_v43 = vmul.f32 0.70710677, %v2702_v53  ;;  %v709_v3 = vadd.f32 %v677_v14, %v608_v46  ;;  %v779_v41 = vmul.f32 %v3357_v38, %v741_v49  ;;  %v880_v25 = vmul.f32 %v2188_v24, %v843_v12  ;;  %v1047_v12 = vld [vmem:[#allocation2 + $0x127] sm:$0xff] }
  0x7f   : > { %v1921_v31 = vpop.eup %1920  ;;  %1682 = vst.msk [vmem:[%s2621_s8 + $0x38] sm:$0xff] %vm315_vm0, %v1650_v54  ;;  %v1479_v35 = vadd.f32 1.0, %v1919_v30  ;;  %v1012_v18 = vadd.f32 %v980_v45, %v911_v7  ;;  %v476_v5 = vmul.f32 %v3349_v17, %v2514_v58  ;;  %v577_v59 = vmul.f32 %v3351_v62, %v2568_v44  ;;  %v3371_v54 = vld [vmem:[#allocation13_spill] sm:$0xff] }
  0x80   : > { %v1480_v61 = vadd.f32 1.0, %v1921_v31  ;;  %1924 = verf.f32 %v1418_v43  ;;  %v811_v6 = vadd.f32 %v779_v41, %v709_v3  ;;  %v981_v16 = vmul.f32 %v2366_v40, %v2675_v1  ;;  %v1149_v3 = vld [vmem:[#allocation2 + $0x128] sm:$0xff] }
  0x81   : > { %v1511_v0 = vmul.f32 %v1479_v35, %v1383_v56  ;;  %v1115_v32 = vadd.f32 %v1083_v27, %v1012_v18  ;;  %v1084_v20 = vmul.f32 %v2200_v28, %v1046_v52  ;;  %v609_v10 = vadd.f32 %v577_v59, %v476_v5  ;;  %v2749_v41 = vld [vmem:[#allocation2 + $0x129] sm:$0xff] }
  0x82   : > { %v1512_v55 = vmul.f32 %v1480_v61, %v1384_v29  ;;  %v912_v15 = vadd.f32 %v880_v25, %v811_v6  ;;  %v678_v58 = vmul.f32 %v2349_v8, %v2642_v60  ;;  %v1185_v26 = vmul.f32 %v3354_v50, %v1148_v36  ;;  %v441_v25 = vld [vmem:[#allocation2 + $0x107] sm:$0xff] }
  0x83   : > { %v1581_v2 = vmul.f32 %v2596_v48, %v1511_v0  ;;  %v1216_v22 = vadd.f32 %v1184_v42, %v1115_v32  ;;  %v1286_v44 = vmul.f32 %v2371_v9, %v2720_v4  ;;  %v780_v37 = vmul.f32 %v3357_v38, %v1045_v33  ;;  %v542_v5 = vld [vmem:[#allocation2 + $0x108] sm:$0xff] }
  0x84   : > { %v1582_v56 = vmul.f32 %v2596_v48, %v1512_v55  ;;  %v1013_v11 = vadd.f32 %v981_v16, %v912_v15  ;;  %v710_v47 = vadd.f32 %v678_v58, %v609_v10  ;;  %v881_v49 = vmul.f32 %v2188_v24, %v1147_v23  ;;  %v3372_v23 = vld [vmem:[#allocation14_spill] sm:$0xff] }
  0x85   : > { %v1619_v29 = vadd.f32 %v2606_v39, %v1581_v2  ;;  %v1317_v45 = vadd.f32 %v1285_v57, %v1216_v22  ;;  %v477_v60 = vmul.f32 %v3349_v17, %v2646_v13  ;;  %v578_v21 = vmul.f32 %v3351_v62, %v2658_v34 }
  0x86   : > { %v1620_v27 = vadd.f32 %v2606_v39, %v1582_v56  ;;  %v1116_v46 = vadd.f32 %v1084_v20, %v1013_v11  ;;  %v812_v14 = vadd.f32 %v780_v37, %v710_v47  ;;  %v982_v42 = vmul.f32 %v2366_v40, %v2699_v19  ;;  %v1150_v47 = vld [vmem:[#allocation2 + $0x130] sm:$0xff] }
  0x87   : > { %v1651_v7 = vadd.f32 %v1619_v29, %v3371_v54  ;;  %v1355_v33 = vadd.f32 %v2504_v63, %v1317_v45  ;;  %v679_v17 = vmul.f32 %v2349_v8, %v2675_v1  ;;  %v610_v62 = vadd.f32 %v578_v21, %v477_v60  ;;  %v2784_v37 = vld [vmem:[#allocation2 + $0x131] sm:$0xff]  ;;  %v3373_v21 = vld [vmem:[#allocation15_spill] sm:$0xff] }
  0x88   : > { %v1923_v13 = vpop.eup %1922  ;;  %v1652_v30 = vadd.f32 %v1620_v27, %v3372_v23  ;;  %v1217_v43 = vadd.f32 %v1185_v26, %v1116_v46  ;;  %v913_v57 = vadd.f32 %v881_v49, %v812_v14  ;;  %v1386_v31 = vmul.f32 0.5, %v2702_v53  ;;  %v442_v49 = vld [vmem:[#allocation2 + $0x10f] sm:$0xff] }
  0x89   : > { %1683 = vst.msk [vmem:[%s2621_s8 + $0x40] sm:$0xff] %vm315_vm0, %v1651_v7  ;;  %v1481_v34 = vadd.f32 1.0, %v1923_v13  ;;  %v1419_v35 = vmul.f32 0.70710677, %v1355_v33  ;;  %v1085_v18 = vmul.f32 %v2200_v28, %v1047_v12  ;;  %v711_v6 = vadd.f32 %v679_v17, %v610_v62  ;;  %v543_v14 = vld [vmem:[#allocation2 + $0x110] sm:$0xff] }
  0x8a   : > { %1684 = vst.msk [vmem:[%s2621_s8 + $0x48] sm:$0xff] %vm315_vm0, %v1652_v30  ;;  %v1318_v1 = vadd.f32 %v1286_v44, %v1217_v43  ;;  %v1014_v61 = vadd.f32 %v982_v42, %v913_v57  ;;  %v781_v59 = vmul.f32 %v3357_v38, %v1046_v52  ;;  %v1186_v32 = vmul.f32 %v3354_v50, %v1149_v3  ;;  %v2767_v38 = vld [vmem:[#allocation2 + $0x12f] sm:$0xff]  ;;  %v2772_v50 = vld [vmem:[%s3269_s1] ss:$0 sm:$0xff]  ;;  %v2778_v52 = vld [vmem:[%s3269_s1 + $0x1] ss:$0 sm:$0xff] }
  0x8b   : > { %v1513_v0 = vmul.f32 %v1481_v34, %v2708_v51  ;;  %1926 = verf.f32 %v1419_v35  ;;  %v1287_v53 = vmul.f32 %v2371_v9, %v2749_v41  ;;  %v2762_v16 = vmul.f32 0.5, %v1355_v33  ;;  %v2794_v42 = vld [vmem:[%s3269_s1 + $0x4] ss:$0 sm:$0xff]  ;;  %v1049_v43 = vld [vmem:[#allocation2 + $0x147] sm:$0xff] }
  0x8c   : > { %v1356_v20 = vadd.f32 %v2504_v63, %v1318_v1  ;;  %v1117_v55 = vadd.f32 %v1085_v18, %v1014_v61  ;;  %v813_v15 = vadd.f32 %v781_v59, %v711_v6  ;;  %v882_v2 = vmul.f32 %v2188_v24, %v1148_v36  ;;  %v2817_v1 = vld [vmem:[#allocation2 + $0x149] sm:$0xff] }
  0x8d   : > { %v1925_v10 = vpop.eup %1924  ;;  %v1583_v58 = vmul.f32 %v2596_v48, %v1513_v0  ;;  %v478_v51 = vmul.f32 %v2772_v50, %v441_v25  ;;  %v579_v22 = vmul.f32 %v2778_v52, %v542_v5  ;;  %v983_v24 = vmul.f32 %v2366_v40, %v2720_v4  ;;  %v1151_v5 = vld [vmem:[#allocation2 + $0x148] sm:$0xff] }
  0x8e   : > { %v1482_v26 = vadd.f32 1.0, %v1925_v10  ;;  %v1420_v44 = vmul.f32 0.70710677, %v1356_v20  ;;  %v1218_v56 = vadd.f32 %v1186_v32, %v1117_v55  ;;  %v914_v11 = vadd.f32 %v882_v2, %v813_v15  ;;  %v443_v6 = vld [vmem:[#allocation2 + $0x127] sm:$0xff] }
  0x8f   : > { %v1621_v36 = vadd.f32 %v2606_v39, %v1583_v58  ;;  %v611_v29 = vadd.f32 %v579_v22, %v478_v51  ;;  %v680_v45 = vmul.f32 %v2349_v8, %v2699_v19  ;;  %v1086_v46 = vmul.f32 %v2200_v28, %v2767_v38  ;;  %v2802_v28 = vld [vmem:[%s3269_s1 + $0x9] ss:$0 sm:$0xff] }
  0x90   : > { %v1514_v60 = vmul.f32 %v1482_v26, %v1386_v31  ;;  %1928 = verf.f32 %v1420_v44  ;;  %v1319_v27 = vadd.f32 %v1287_v53, %v1218_v56  ;;  %v1015_v7 = vadd.f32 %v983_v24, %v914_v11  ;;  %v3374_v55 = vld [vmem:[#allocation16_spill] sm:$0xff] }
  0x91   : > { %v1653_v54 = vadd.f32 %v1621_v36, %v3373_v21  ;;  %v712_v33 = vadd.f32 %v680_v45, %v611_v29  ;;  %v782_v19 = vmul.f32 %v2794_v42, %v1047_v12  ;;  %v1187_v23 = vmul.f32 %v2802_v28, %v1150_v47  ;;  %v2812_v12 = vld [vmem:[%s3269_s1 + $0x5] ss:$0 sm:$0xff]  ;;  %v1050_v44 = vld [vmem:[#allocation2 + $0x14f] sm:$0xff] }
  0x92   : > { %v1584_v17 = vmul.f32 %v2596_v48, %v1514_v60  ;;  %v1357_v13 = vadd.f32 %v2504_v63, %v1319_v27  ;;  %v1288_v30 = vmul.f32 %v2371_v9, %v2784_v37  ;;  %v1118_v57 = vadd.f32 %v1086_v46, %v1015_v7  ;;  %v2840_v29 = vld [vmem:[#allocation2 + $0x150] sm:$0xff] }
  0x93   : > { %1685 = vst.msk [vmem:[%s2621_s8 + $0x50] sm:$0xff] %vm315_vm0, %v1653_v54  ;;  %v814_v62 = vadd.f32 %v782_v19, %v712_v33  ;;  %v883_v34 = vmul.f32 %v2812_v12, %v1149_v3  ;;  %v479_v31 = vmul.f32 %v2772_v50, %v442_v49  ;;  %v1388_v18 = vmul.f32 0.5, %v1356_v20  ;;  %v2825_v3 = vld [vmem:[%s3269_s1 + $0x8] ss:$0 sm:$0xff]  ;;  %v2844_v27 = vld [vmem:[#allocation2 + $0x151] sm:$0xff] }
  0x94   : > { %v1622_v35 = vadd.f32 %v2606_v39, %v1584_v17  ;;  %v1421_v25 = vmul.f32 0.70710677, %v1357_v13  ;;  %v580_v61 = vmul.f32 %v2778_v52, %v543_v14  ;;  %v1219_v59 = vadd.f32 %v1187_v23, %v1118_v57  ;;  %v544_v20 = vld [vmem:[#allocation2 + $0x128] sm:$0xff]  ;;  %v545_v23 = vld [vmem:[#allocation2 + $0x130] sm:$0xff] }
  0x95   : > { %v915_v0 = vadd.f32 %v883_v34, %v814_v62  ;;  %v984_v32 = vmul.f32 %v2366_v40, %v2749_v41  ;;  %v1087_v53 = vmul.f32 %v2825_v3, %v1049_v43  ;;  %v681_v58 = vmul.f32 %v2349_v8, %v2720_v4 }
  0x96   : > { %v1654_v15 = vadd.f32 %v1622_v35, %v3374_v55  ;;  %1930 = verf.f32 %v1421_v25  ;;  %v612_v10 = vadd.f32 %v580_v61, %v479_v31  ;;  %v1320_v2 = vadd.f32 %v1288_v30, %v1219_v59  ;;  %v1547_v25 = vld [vmem:[%s2106_s25 + $0x60] sm:$0xff] }
  0x97   : > { %v1016_v51 = vadd.f32 %v984_v32, %v915_v0  ;;  %v1188_v22 = vmul.f32 %v2802_v28, %v1151_v5  ;;  %v1289_v26 = vmul.f32 %v2371_v9, %v2817_v1  ;;  %v2836_v24 = vmul.f32 0.5, %v1357_v13  ;;  %v444_v13 = vld [vmem:[#allocation2 + $0x12f] sm:$0xff] }
  0x98   : > { %v1927_v56 = vpop.eup %1926  ;;  %1686 = vst.msk [vmem:[%s2621_s8 + $0x58] sm:$0xff] %vm315_vm0, %v1654_v15  ;;  %v713_v36 = vadd.f32 %v681_v58, %v612_v10  ;;  %v783_v11 = vmul.f32 %v2794_v42, %v2767_v38  ;;  %v480_v4 = vmul.f32 %v2772_v50, %v443_v6  ;;  %v1358_v49 = vadd.f32 %v2504_v63, %v1320_v2  ;;  %v1051_v10 = vld [vmem:[#allocation2 + $0x167] sm:$0xff] }
  0x99   : > { %v1483_v45 = vadd.f32 1.0, %v1927_v56  ;;  %v1119_v60 = vadd.f32 %v1087_v53, %v1016_v51  ;;  %v581_v46 = vmul.f32 %v2778_v52, %v544_v20  ;;  %v884_v21 = vmul.f32 %v2812_v12, %v1150_v47 }
  0x9a   : > { %v815_v14 = vadd.f32 %v783_v11, %v713_v36  ;;  %v985_v54 = vmul.f32 %v2366_v40, %v2784_v37  ;;  %v1088_v38 = vmul.f32 %v2825_v3, %v1050_v44  ;;  %v1422_v33 = vmul.f32 0.70710677, %v1358_v49  ;;  %v1153_v36 = vld [vmem:[#allocation2 + $0x168] sm:$0xff] }
  0x9b   : > { %v1515_v7 = vmul.f32 %v1483_v45, %v2762_v16  ;;  %v1220_v19 = vadd.f32 %v1188_v22, %v1119_v60  ;;  %v1189_v17 = vmul.f32 %v2802_v28, %v2840_v29  ;;  %v1290_v57 = vmul.f32 %v2371_v9, %v2844_v27  ;;  %v2873_v11 = vld [vmem:[#allocation2 + $0x169] sm:$0xff] }
  0x9c   : > { %v916_v30 = vadd.f32 %v884_v21, %v815_v14  ;;  %v613_v47 = vadd.f32 %v581_v46, %v480_v4  ;;  %v682_v62 = vmul.f32 %v2349_v8, %v2749_v41  ;;  %1932 = verf.f32 %v1422_v33  ;;  %v1548_v45 = vld [vmem:[%s2106_s25 + $0x68] sm:$0xff] }
  0x9d   : > { %v1929_v34 = vpop.eup %1928  ;;  %v1585_v31 = vmul.f32 %v2596_v48, %v1515_v7  ;;  %v1321_v16 = vadd.f32 %v1289_v26, %v1220_v19  ;;  %v784_v35 = vmul.f32 %v2794_v42, %v1049_v43  ;;  %v885_v0 = vmul.f32 %v2812_v12, %v1151_v5  ;;  %v546_v46 = vld [vmem:[#allocation2 + $0x148] sm:$0xff] }
  0x9e   : > { %v1484_v61 = vadd.f32 1.0, %v1929_v34  ;;  %v1017_v6 = vadd.f32 %v985_v54, %v916_v30  ;;  %v714_v59 = vadd.f32 %v682_v62, %v613_v47  ;;  %v481_v53 = vmul.f32 %v2772_v50, %v444_v13  ;;  %v2885_v7 = vld [vmem:[%s3269_s1 + $0xa] ss:$0 sm:$0xff]  ;;  %v2898_v62 = vld [vmem:[%s3269_s1 + $0x6] ss:$0 sm:$0xff] }
  0x9f   : > { %v1623_v32 = vadd.f32 %v2606_v39, %v1585_v31  ;;  %v1359_v9 = vadd.f32 %v2504_v63, %v1321_v16  ;;  %v582_v41 = vmul.f32 %v2778_v52, %v545_v23  ;;  %v2866_v55 = vmul.f32 0.5, %v1358_v49  ;;  %v2902_v31 = vld [vmem:[#allocation2 + $0x170] sm:$0xff] }
  0xa0   : > { %v1516_v20 = vmul.f32 %v1484_v61, %v1388_v18  ;;  %v1120_v43 = vadd.f32 %v1088_v38, %v1017_v6  ;;  %v816_v15 = vadd.f32 %v784_v35, %v714_v59  ;;  %v683_v5 = vmul.f32 %v2349_v8, %v2784_v37  ;;  %v445_v37 = vld [vmem:[#allocation2 + $0x147] sm:$0xff]  ;;  %v1549_v6 = vld [vmem:[%s2106_s25 + $0x70] sm:$0xff] }
  0xa1   : > { %v1655_v58 = vadd.f32 %v1623_v32, %v1547_v25  ;;  %v1423_v2 = vmul.f32 0.70710677, %v1359_v9  ;;  %v614_v51 = vadd.f32 %v582_v41, %v481_v53  ;;  %v986_v18 = vmul.f32 %v2366_v40, %v2817_v1  ;;  %v2912_v32 = vld [vmem:[#allocation2 + $0x171] sm:$0xff]  ;;  %v2917_v41 = vld [vmem:[%s3269_s1 + $0x2] ss:$0 sm:$0xff] }
  0xa2   : > { %v1586_v22 = vmul.f32 %v2596_v48, %v1516_v20  ;;  %v1221_v26 = vadd.f32 %v1189_v17, %v1120_v43  ;;  %v917_v56 = vadd.f32 %v885_v0, %v816_v15  ;;  %v1089_v49 = vmul.f32 %v2825_v3, %v1051_v10 }
  0xa3   : > { %v1931_v4 = vpop.eup %1930  ;;  %1687 = vst.msk [vmem:[%s2621_s8 + $0x60] sm:$0xff] %vm315_vm0, %v1655_v58  ;;  %1934 = verf.f32 %v1423_v2  ;;  %v715_v60 = vadd.f32 %v683_v5, %v614_v51  ;;  %v785_v8 = vmul.f32 %v2794_v42, %v1050_v44  ;;  %v1190_v38 = vmul.f32 %v2802_v28, %v1153_v36  ;;  %v547_v51 = vld [vmem:[#allocation2 + $0x150] sm:$0xff] }
  0xa4   : > { %v1624_v14 = vadd.f32 %v2606_v39, %v1586_v22  ;;  %v1485_v21 = vadd.f32 1.0, %v1931_v4  ;;  %v1322_v54 = vadd.f32 %v1290_v57, %v1221_v26  ;;  %v1018_v40 = vadd.f32 %v986_v18, %v917_v56  ;;  %v2893_v57 = vld [vmem:[#allocation2 + $0x16f] sm:$0xff] }
  0xa5   : > { %v1291_v33 = vmul.f32 %v2885_v7, %v2873_v11  ;;  %v817_v19 = vadd.f32 %v785_v8, %v715_v60  ;;  %v886_v44 = vmul.f32 %v2812_v12, %v2840_v29  ;;  %v987_v34 = vmul.f32 %v2898_v62, %v2844_v27 }
  0xa6   : > { %v1656_v17 = vadd.f32 %v1624_v14, %v1548_v45  ;;  %v1517_v13 = vmul.f32 %v1485_v21, %v2836_v24  ;;  %v1360_v23 = vadd.f32 %v2504_v63, %v1322_v54  ;;  %v1121_v30 = vadd.f32 %v1089_v49, %v1018_v40  ;;  %v1053_v49 = vld [vmem:[#allocation2 + $0x187] sm:$0xff] }
  0xa7   : > { %v918_v47 = vadd.f32 %v886_v44, %v817_v19  ;;  %v482_v29 = vmul.f32 %v2772_v50, %v445_v37  ;;  %v583_v24 = vmul.f32 %v2778_v52, %v546_v46  ;;  %v1391_v35 = vmul.f32 0.5, %v1359_v9  ;;  %v446_v9 = vld [vmem:[#allocation2 + $0x14f] sm:$0xff] }
  0xa8   : > { %1688 = vst.msk [vmem:[%s2621_s8 + $0x68] sm:$0xff] %vm315_vm0, %v1656_v17  ;;  %v1587_v16 = vmul.f32 %v2596_v48, %v1517_v13  ;;  %v1424_v25 = vmul.f32 0.70710677, %v1360_v23  ;;  %v1222_v61 = vadd.f32 %v1190_v38, %v1121_v30  ;;  %v1090_v0 = vmul.f32 %v2825_v3, %v2893_v57  ;;  %v2930_v46 = vld [vmem:[#allocation2 + $0x188] sm:$0xff]  ;;  %v1550_v17 = vld [vmem:[%s2106_s25 + $0x78] sm:$0xff] }
  0xa9   : > { %v1019_v59 = vadd.f32 %v987_v34, %v918_v47  ;;  %v615_v53 = vadd.f32 %v583_v24, %v482_v29  ;;  %v684_v20 = vmul.f32 %v2917_v41, %v2817_v1  ;;  %v1933_v43 = vpop.eup %1932  ;;  %v1191_v2 = vmul.f32 %v2802_v28, %v2902_v31  ;;  %v2940_v19 = vld [vmem:[#allocation2 + $0x189] sm:$0xff] }
  0xaa   : > { %v1625_v15 = vadd.f32 %v2606_v39, %v1587_v16  ;;  %1936 = verf.f32 %v1424_v25  ;;  %v1323_v58 = vadd.f32 %v1291_v33, %v1222_v61  ;;  %v1486_v5 = vadd.f32 1.0, %v1933_v43  ;;  %v447_v47 = vld [vmem:[#allocation2 + $0x167] sm:$0xff] }
  0xab   : > { %v1122_v22 = vadd.f32 %v1090_v0, %v1019_v59  ;;  %v716_v26 = vadd.f32 %v684_v20, %v615_v53  ;;  %v786_v56 = vmul.f32 %v2794_v42, %v1051_v10  ;;  %v1292_v1 = vmul.f32 %v2885_v7, %v2912_v32  ;;  %v548_v34 = vld [vmem:[#allocation2 + $0x168] sm:$0xff] }
  0xac   : > { %v1657_v18 = vadd.f32 %v1625_v15, %v1549_v6  ;;  %v1361_v4 = vadd.f32 %v2504_v63, %v1323_v58  ;;  %v887_v45 = vmul.f32 %v2812_v12, %v1153_v36  ;;  %v1518_v60 = vmul.f32 %v1486_v5, %v2866_v55  ;;  %v1054_v53 = vld [vmem:[#allocation2 + $0x18f] sm:$0xff] }
  0xad   : > { %v1223_v8 = vadd.f32 %v1191_v2, %v1122_v22  ;;  %v818_v37 = vadd.f32 %v786_v56, %v716_v26  ;;  %v483_v14 = vmul.f32 %v2772_v50, %v446_v9  ;;  %v1392_v10 = vmul.f32 0.5, %v1360_v23  ;;  %v1156_v58 = vld [vmem:[#allocation2 + $0x190] sm:$0xff]  ;;  %v1551_v56 = vld [vmem:[%s2106_s25 + $0x80] sm:$0xff] }
  0xae   : > { %1689 = vst.msk [vmem:[%s2621_s8 + $0x70] sm:$0xff] %vm315_vm0, %v1657_v18  ;;  %v1425_v21 = vmul.f32 0.70710677, %v1361_v4  ;;  %v988_v54 = vmul.f32 %v2898_v62, %v2873_v11  ;;  %v584_v40 = vmul.f32 %v2778_v52, %v547_v51  ;;  %v1588_v36 = vmul.f32 %v2596_v48, %v1518_v60  ;;  %v2957_v2 = vld [vmem:[#allocation2 + $0x191] sm:$0xff] }
  0xaf   : > { %v1324_v38 = vadd.f32 %v1292_v1, %v1223_v8  ;;  %v919_v55 = vadd.f32 %v887_v45, %v818_v37  ;;  %v1091_v33 = vmul.f32 %v2825_v3, %v1053_v49  ;;  %v1192_v13 = vmul.f32 %v2802_v28, %v2930_v46  ;;  %v549_v26 = vld [vmem:[#allocation2 + $0x170] sm:$0xff] }
  0xb0   : > { %v1935_v44 = vpop.eup %1934  ;;  %1938 = verf.f32 %v1425_v21  ;;  %v616_v23 = vadd.f32 %v584_v40, %v483_v14  ;;  %v685_v30 = vmul.f32 %v2917_v41, %v2844_v27  ;;  %v1626_v29 = vadd.f32 %v2606_v39, %v1588_v36 }
  0xb1   : > { %v1487_v24 = vadd.f32 1.0, %v1935_v44  ;;  %v1362_v16 = vadd.f32 %v2504_v63, %v1324_v38  ;;  %v1020_v25 = vadd.f32 %v988_v54, %v919_v55  ;;  %v2949_v61 = vmul.f32 0.5, %v1361_v4  ;;  %v1055_v44 = vld [vmem:[#allocation2 + $0x1a7] sm:$0xff] }
  0xb2   : > { %v1293_v6 = vmul.f32 %v2885_v7, %v2940_v19  ;;  %v717_v59 = vadd.f32 %v685_v30, %v616_v23  ;;  %v787_v0 = vmul.f32 %v2794_v42, %v2893_v57  ;;  %v1658_v27 = vadd.f32 %v1626_v29, %v1550_v17  ;;  %v2982_v23 = vld [vmem:[%s3270_s2] ss:$0 sm:$0xff] }
  0xb3   : > { %v1519_v20 = vmul.f32 %v1487_v24, %v1391_v35  ;;  %v1426_v43 = vmul.f32 0.70710677, %v1362_v16  ;;  %v888_v9 = vmul.f32 %v2812_v12, %v2902_v31  ;;  %v1123_v63 = vadd.f32 %v1091_v33, %v1020_v25  ;;  %v448_v31 = vld [vmem:[#allocation2 + $0x16f] sm:$0xff] }
  0xb4   : > { %v819_v15 = vadd.f32 %v787_v0, %v717_v59  ;;  %v484_v51 = vmul.f32 %v2772_v50, %v447_v47  ;;  %v585_v5 = vmul.f32 %v2778_v52, %v548_v34  ;;  %1690 = vst.msk [vmem:[%s2621_s8 + $0x78] sm:$0xff] %vm315_vm0, %v1658_v27  ;;  %v989_v35 = vmul.f32 %v2898_v62, %v2912_v32  ;;  %v2987_v34 = vld [vmem:[#allocation2 + $0x1a8] sm:$0xff] }
  0xb5   : > { %v1589_v57 = vmul.f32 %v2596_v48, %v1519_v20  ;;  %1940 = verf.f32 %v1426_v43  ;;  %v1092_v22 = vmul.f32 %v2825_v3, %v1054_v53  ;;  %v1224_v18 = vadd.f32 %v1192_v13, %v1123_v63  ;;  %v3000_v27 = vld [vmem:[#allocation2 + $0x1a9] sm:$0xff] }
  0xb6   : > { %v920_v4 = vadd.f32 %v888_v9, %v819_v15  ;;  %v617_v1 = vadd.f32 %v585_v5, %v484_v51  ;;  %v686_v45 = vmul.f32 %v2917_v41, %v2873_v11  ;;  %v1193_v37 = vmul.f32 %v2802_v28, %v1156_v58  ;;  %v449_v43 = vld [vmem:[#allocation2 + $0x187] sm:$0xff] }
  0xb7   : > { %v1937_v60 = vpop.eup %1936  ;;  %v1627_v8 = vadd.f32 %v2606_v39, %v1589_v57  ;;  %v1294_v14 = vmul.f32 %v2885_v7, %v2957_v2  ;;  %v788_v21 = vmul.f32 %v2794_v42, %v1053_v49  ;;  %v1325_v40 = vadd.f32 %v1293_v6, %v1224_v18  ;;  %v1552_v9 = vld [vmem:[%s2106_s25 + $0x88] sm:$0xff] }
  0xb8   : > { %v1488_v54 = vadd.f32 1.0, %v1937_v60  ;;  %v1021_v36 = vadd.f32 %v989_v35, %v920_v4  ;;  %v718_v38 = vadd.f32 %v686_v45, %v617_v1  ;;  %v2975_v33 = vmul.f32 0.5, %v1362_v16  ;;  %v3010_v18 = vld [vmem:[#allocation2 + $0x1af] sm:$0xff] }
  0xb9   : > { %v1659_v55 = vadd.f32 %v1627_v8, %v1551_v56  ;;  %v485_v11 = vmul.f32 %v2772_v50, %v448_v31  ;;  %v586_v17 = vmul.f32 %v2778_v52, %v549_v26  ;;  %v2985_v49 = vadd.f32 %v2982_v23, %v1325_v40 }
  0xba   : > { %v1520_v13 = vmul.f32 %v1488_v54, %v1392_v10  ;;  %v1124_v30 = vadd.f32 %v1092_v22, %v1021_v36  ;;  %v820_v47 = vadd.f32 %v788_v21, %v718_v38  ;;  %v889_v29 = vmul.f32 %v2812_v12, %v2930_v46  ;;  %v1553_v38 = vld [vmem:[%s2106_s25 + $0x90] sm:$0xff] }
  0xbb   : > { %1691 = vst.msk [vmem:[%s2621_s8 + $0x80] sm:$0xff] %vm315_vm0, %v1659_v55  ;;  %v990_v10 = vmul.f32 %v2898_v62, %v2940_v19  ;;  %v618_v24 = vadd.f32 %v586_v17, %v485_v11  ;;  %v687_v16 = vmul.f32 %v2917_v41, %v2912_v32  ;;  %v1427_v6 = vmul.f32 0.70710677, %v2985_v49  ;;  %v550_v32 = vld [vmem:[#allocation2 + $0x188] sm:$0xff] }
  0xbc   : > { %v1590_v25 = vmul.f32 %v2596_v48, %v1520_v13  ;;  %v1225_v59 = vadd.f32 %v1193_v37, %v1124_v30  ;;  %v1093_v0 = vmul.f32 %v2825_v3, %v1055_v44  ;;  %v921_v46 = vadd.f32 %v889_v29, %v820_v47  ;;  %v3028_v13 = vld [vmem:[#allocation2 + $0x1b1] sm:$0xff] }
  0xbd   : > { %v1939_v20 = vpop.eup %1938  ;;  %v1194_v63 = vmul.f32 %v2802_v28, %v2987_v34  ;;  %v719_v15 = vadd.f32 %v687_v16, %v618_v24  ;;  %v789_v51 = vmul.f32 %v2794_v42, %v1054_v53  ;;  %1942 = verf.f32 %v1427_v6  ;;  %v450_v24 = vld [vmem:[#allocation2 + $0x18f] sm:$0xff] }
  0xbe   : > { %v1628_v5 = vadd.f32 %v2606_v39, %v1590_v25  ;;  %v1489_v57 = vadd.f32 1.0, %v1939_v20  ;;  %v1326_v35 = vadd.f32 %v1294_v14, %v1225_v59  ;;  %v1022_v22 = vadd.f32 %v990_v10, %v921_v46  ;;  %v3017_v14 = vld [vmem:[#allocation2 + $0x1b0] sm:$0xff]  ;;  %v1057_v46 = vld [vmem:[#allocation2 + $0x1c7] sm:$0xff] }
  0xbf   : > { %v1295_v31 = vmul.f32 %v2885_v7, %v3000_v27  ;;  %v821_v26 = vadd.f32 %v789_v51, %v719_v15  ;;  %v890_v56 = vmul.f32 %v2812_v12, %v1156_v58  ;;  %v486_v45 = vmul.f32 %v2772_v50, %v449_v43  ;;  %v551_v16 = vld [vmem:[#allocation2 + $0x190] sm:$0xff] }
  0xc0   : > { %v1660_v4 = vadd.f32 %v1628_v5, %v1552_v9  ;;  %v1521_v53 = vmul.f32 %v1489_v57, %v2949_v61  ;;  %v1364_v1 = vadd.f32 %v2982_v23, %v1326_v35  ;;  %v1125_v60 = vadd.f32 %v1093_v0, %v1022_v22  ;;  %v3049_v57 = vld [vmem:[#allocation2 + $0x1c9] sm:$0xff] }
  0xc1   : > { %v922_v8 = vadd.f32 %v890_v56, %v821_v26  ;;  %v991_v37 = vmul.f32 %v2898_v62, %v2957_v2  ;;  %v587_v21 = vmul.f32 %v2778_v52, %v550_v32  ;;  %v1094_v61 = vmul.f32 %v2825_v3, %v3010_v18  ;;  %v1159_v32 = vld [vmem:[#allocation2 + $0x1c8] sm:$0xff] }
  0xc2   : > { %v1941_v58 = vpop.eup %1940  ;;  %1692 = vst.msk [vmem:[%s2621_s8 + $0x88] sm:$0xff] %vm315_vm0, %v1660_v4  ;;  %v1591_v54 = vmul.f32 %v2596_v48, %v1521_v53  ;;  %v1428_v40 = vmul.f32 0.70710677, %v1364_v1  ;;  %v688_v36 = vmul.f32 %v2917_v41, %v2940_v19  ;;  %v1226_v11 = vadd.f32 %v1194_v63, %v1125_v60  ;;  %v451_v4 = vld [vmem:[#allocation2 + $0x1a7] sm:$0xff] }
  0xc3   : > { %v1490_v55 = vadd.f32 1.0, %v1941_v58  ;;  %v1023_v17 = vadd.f32 %v991_v37, %v922_v8  ;;  %v619_v30 = vadd.f32 %v587_v21, %v486_v45  ;;  %v1195_v29 = vmul.f32 %v2802_v28, %v3017_v14  ;;  %v552_v8 = vld [vmem:[#allocation2 + $0x1a8] sm:$0xff] }
  0xc4   : > { %v1629_v47 = vadd.f32 %v2606_v39, %v1591_v54  ;;  %1944 = verf.f32 %v1428_v40  ;;  %v790_v10 = vmul.f32 %v2794_v42, %v1055_v44  ;;  %v1327_v25 = vadd.f32 %v1295_v31, %v1226_v11 }
  0xc5   : > { %v1522_v19 = vmul.f32 %v1490_v55, %v2975_v33  ;;  %v1126_v6 = vadd.f32 %v1094_v61, %v1023_v17  ;;  %v720_v59 = vadd.f32 %v688_v36, %v619_v30  ;;  %v1395_v20 = vmul.f32 0.5, %v2985_v49  ;;  %v1554_v33 = vld [vmem:[%s2106_s25 + $0x98] sm:$0xff]  ;;  %v1058_v36 = vld [vmem:[#allocation2 + $0x1cf] sm:$0xff] }
  0xc6   : > { %v1661_v0 = vadd.f32 %v1629_v47, %v1553_v38  ;;  %v3036_v43 = vmul.f32 0.5, %v1364_v1  ;;  %v1296_v9 = vmul.f32 %v2885_v7, %v3028_v13  ;;  %v1365_v63 = vadd.f32 %v2982_v23, %v1327_v25  ;;  %v3063_v38 = vld [vmem:[#allocation2 + $0x1d0] sm:$0xff] }
  0xc7   : > { %v1592_v44 = vmul.f32 %v2596_v48, %v1522_v19  ;;  %v1227_v15 = vadd.f32 %v1195_v29, %v1126_v6  ;;  %v822_v51 = vadd.f32 %v790_v10, %v720_v59  ;;  %v891_v5 = vmul.f32 %v2812_v12, %v2987_v34  ;;  %v3072_v10 = vld [vmem:[#allocation2 + $0x1d1] sm:$0xff]  ;;  %v3083_v6 = vld [vmem:[%s3271_s3] ss:$0 sm:$0xff] }
  0xc8   : > { %1693 = vst.msk [vmem:[%s2621_s8 + $0x90] sm:$0xff] %vm315_vm0, %v1661_v0  ;;  %v992_v49 = vmul.f32 %v2898_v62, %v3000_v27  ;;  %v487_v35 = vmul.f32 %v2772_v50, %v450_v24  ;;  %v588_v48 = vmul.f32 %v2778_v52, %v551_v16  ;;  %v1429_v31 = vmul.f32 0.70710677, %v1365_v63  ;;  %v553_v25 = vld [vmem:[#allocation2 + $0x1b0] sm:$0xff] }
  0xc9   : > { %v1630_v22 = vadd.f32 %v2606_v39, %v1592_v44  ;;  %v1328_v26 = vadd.f32 %v1296_v9, %v1227_v15  ;;  %v1095_v56 = vmul.f32 %v2825_v3, %v1057_v46  ;;  %v923_v53 = vadd.f32 %v891_v5, %v822_v51 }
  0xca   : > { %v1196_v34 = vmul.f32 %v2802_v28, %v1159_v32  ;;  %v620_v1 = vadd.f32 %v588_v48, %v487_v35  ;;  %v689_v45 = vmul.f32 %v2917_v41, %v2957_v2  ;;  %v1943_v60 = vpop.eup %1942  ;;  %1946 = verf.f32 %v1429_v31 }
  0xcb   : > { %v1662_v37 = vadd.f32 %v1630_v22, %v1554_v33  ;;  %v1366_v21 = vadd.f32 %v2982_v23, %v1328_v26  ;;  %v1297_v39 = vmul.f32 %v2885_v7, %v3049_v57  ;;  %v1491_v58 = vadd.f32 1.0, %v1943_v60  ;;  %v1161_v60 = vld [vmem:[#allocation2 + $0x1e8] sm:$0xff] }
  0xcc   : > { %v1024_v54 = vadd.f32 %v992_v49, %v923_v53  ;;  %v721_v40 = vadd.f32 %v689_v45, %v620_v1  ;;  %v791_v61 = vmul.f32 %v2794_v42, %v3010_v18  ;;  %v3067_v2 = vmul.f32 0.5, %v1365_v63  ;;  %v1555_v63 = vld [vmem:[%s2106_s25 + $0xa0] sm:$0xff] }
  0xcd   : > { %1694 = vst.msk [vmem:[%s2621_s8 + $0x98] sm:$0xff] %vm315_vm0, %v1662_v37  ;;  %v1430_v55 = vmul.f32 0.70710677, %v1366_v21  ;;  %v892_v11 = vmul.f32 %v2812_v12, %v3017_v14  ;;  %v488_v17 = vmul.f32 %v2772_v50, %v451_v4  ;;  %v1523_v30 = vmul.f32 %v1491_v58, %v1395_v20  ;;  %v452_v14 = vld [vmem:[#allocation2 + $0x1af] sm:$0xff]  ;;  %v3097_v49 = vld [vmem:[%s3272_s4] ss:$0 sm:$0xff] }
  0xce   : > { %v1127_v47 = vadd.f32 %v1095_v56, %v1024_v54  ;;  %v823_v29 = vadd.f32 %v791_v61, %v721_v40  ;;  %v589_v18 = vmul.f32 %v2778_v52, %v552_v8  ;;  %v993_v24 = vmul.f32 %v2898_v62, %v3028_v13  ;;  %v1059_v4 = vld [vmem:[#allocation2 + $0x1e7] sm:$0xff] }
  0xcf   : > { %1948 = verf.f32 %v1430_v55  ;;  %v1096_v16 = vmul.f32 %v2825_v3, %v1058_v36  ;;  %v1197_v19 = vmul.f32 %v2802_v28, %v3063_v38  ;;  %v1593_v59 = vmul.f32 %v3083_v6, %v1523_v30  ;;  %v453_v61 = vld [vmem:[#allocation2 + $0x1c7] sm:$0xff] }
  0xd0   : > { %v1228_v0 = vadd.f32 %v1196_v34, %v1127_v47  ;;  %v924_v20 = vadd.f32 %v892_v11, %v823_v29  ;;  %v621_v9 = vadd.f32 %v589_v18, %v488_v17  ;;  %v3087_v15 = vmul.f32 0.5, %v1366_v21  ;;  %v3109_v21 = vld [vmem:[#allocation2 + $0x1e9] sm:$0xff] }
  0xd1   : > { %v1945_v44 = vpop.eup %1944  ;;  %v1298_v51 = vmul.f32 %v2885_v7, %v3072_v10  ;;  %v690_v33 = vmul.f32 %v2917_v41, %v3000_v27  ;;  %v792_v5 = vmul.f32 %v2794_v42, %v1057_v46  ;;  %v1631_v35 = vadd.f32 %v3097_v49, %v1593_v59  ;;  %v554_v55 = vld [vmem:[#allocation2 + $0x1c8] sm:$0xff] }
  0xd2   : > { %v1492_v48 = vadd.f32 1.0, %v1945_v44  ;;  %v1329_v22 = vadd.f32 %v1297_v39, %v1228_v0  ;;  %v1025_v31 = vadd.f32 %v993_v24, %v924_v20  ;;  %v893_v56 = vmul.f32 %v2812_v12, %v1159_v32  ;;  %v1556_v11 = vld [vmem:[%s2106_s25 + $0xa8] sm:$0xff] }
  0xd3   : > { %v722_v26 = vadd.f32 %v690_v33, %v621_v9  ;;  %v489_v53 = vmul.f32 %v2772_v50, %v452_v14  ;;  %v590_v27 = vmul.f32 %v2778_v52, %v553_v25  ;;  %v1663_v46 = vadd.f32 %v1631_v35, %v1555_v63  ;;  %v3126_v0 = vld [vmem:[#allocation2 + $0x1ef] sm:$0xff] }
  0xd4   : > { %v1524_v34 = vmul.f32 %v1492_v48, %v3036_v43  ;;  %v3105_v1 = vadd.f32 %v2982_v23, %v1329_v22  ;;  %v1128_v45 = vadd.f32 %v1096_v16, %v1025_v31  ;;  %v994_v37 = vmul.f32 %v2898_v62, %v3049_v57  ;;  %v1162_v35 = vld [vmem:[#allocation2 + $0x1f0] sm:$0xff] }
  0xd5   : > { %v824_v8 = vadd.f32 %v792_v5, %v722_v26  ;;  %v622_v32 = vadd.f32 %v590_v27, %v489_v53  ;;  %v691_v39 = vmul.f32 %v2917_v41, %v3028_v13  ;;  %1695 = vst.msk [vmem:[%s2621_s8 + $0xa0] sm:$0xff] %vm315_vm0, %v1663_v46  ;;  %v1097_v40 = vmul.f32 %v2825_v3, %v1059_v4  ;;  %v3144_v46 = vld [vmem:[#allocation2 + $0x1f1] sm:$0xff] }
  0xd6   : > { %v1594_v43 = vmul.f32 %v3083_v6, %v1524_v34  ;;  %v1431_v58 = vmul.f32 0.70710677, %v3105_v1  ;;  %v1229_v54 = vadd.f32 %v1197_v19, %v1128_v45  ;;  %v1198_v30 = vmul.f32 %v2802_v28, %v1161_v60  ;;  %v1557_v34 = vld [vmem:[%s2106_s25 + $0xb0] sm:$0xff] }
  0xd7   : > { %v925_v17 = vadd.f32 %v893_v56, %v824_v8  ;;  %v723_v47 = vadd.f32 %v691_v39, %v622_v32  ;;  %v793_v29 = vmul.f32 %v2794_v42, %v1058_v36  ;;  %v1947_v18 = vpop.eup %1946  ;;  %v1299_v16 = vmul.f32 %v2885_v7, %v3109_v21  ;;  %v454_v32 = vld [vmem:[#allocation2 + $0x1cf] sm:$0xff] }
  0xd8   : > { %v1632_v13 = vadd.f32 %v3097_v49, %v1594_v43  ;;  %1950 = verf.f32 %v1431_v58  ;;  %v1330_v24 = vadd.f32 %v1298_v51, %v1229_v54  ;;  %v1493_v19 = vadd.f32 1.0, %v1947_v18  ;;  %v555_v39 = vld [vmem:[#allocation2 + $0x1d0] sm:$0xff] }
  0xd9   : > { %v1026_v14 = vadd.f32 %v994_v37, %v925_v17  ;;  %v825_v25 = vadd.f32 %v793_v29, %v723_v47  ;;  %v894_v59 = vmul.f32 %v2812_v12, %v3063_v38  ;;  %v490_v9 = vmul.f32 %v2772_v50, %v453_v61  ;;  %v1061_v47 = vld [vmem:[#allocation2 + $0x207] sm:$0xff]  ;;  %v1558_v29 = vld [vmem:[%s2106_s25 + $0xb8] sm:$0xff] }
  0xda   : > { %v1664_v20 = vadd.f32 %v1632_v13, %v1556_v11  ;;  %v3129_v36 = vadd.f32 %v2982_v23, %v1330_v24  ;;  %v591_v44 = vmul.f32 %v2778_v52, %v554_v55  ;;  %v1525_v63 = vmul.f32 %v1493_v19, %v3067_v2  ;;  %v1163_v13 = vld [vmem:[#allocation2 + $0x208] sm:$0xff] }
  0xdb   : > { %v1129_v51 = vadd.f32 %v1097_v40, %v1026_v14  ;;  %v926_v33 = vadd.f32 %v894_v59, %v825_v25  ;;  %v995_v5 = vmul.f32 %v2898_v62, %v3072_v10  ;;  %v1098_v22 = vmul.f32 %v2825_v3, %v3126_v0 }
  0xdc   : > { %v1949_v38 = vpop.eup %1948  ;;  %1696 = vst.msk [vmem:[%s2621_s8 + $0xa8] sm:$0xff] %vm315_vm0, %v1664_v20  ;;  %v1432_v48 = vmul.f32 0.70710677, %v3129_v36  ;;  %v623_v31 = vadd.f32 %v591_v44, %v490_v9  ;;  %v692_v26 = vmul.f32 %v2917_v41, %v3049_v57  ;;  %v1595_v2 = vmul.f32 %v3083_v6, %v1525_v63  ;;  %v1264_v9 = vld [vmem:[#allocation2 + $0x209] sm:$0xff] }
  0xdd   : > { %v1494_v56 = vadd.f32 1.0, %v1949_v38  ;;  %v1230_v53 = vadd.f32 %v1198_v30, %v1129_v51  ;;  %v1027_v27 = vadd.f32 %v995_v5, %v926_v33  ;;  %v1199_v45 = vmul.f32 %v2802_v28, %v1162_v35  ;;  %v455_v33 = vld [vmem:[#allocation2 + $0x1e7] sm:$0xff] }
  0xde   : > { %1952 = verf.f32 %v1432_v48  ;;  %v724_v8 = vadd.f32 %v692_v26, %v623_v31  ;;  %v794_v37 = vmul.f32 %v2794_v42, %v1059_v4  ;;  %v1633_v43 = vadd.f32 %v3097_v49, %v1595_v2  ;;  %v556_v48 = vld [vmem:[#allocation2 + $0x1e8] sm:$0xff] }
  0xdf   : > { %v1526_v57 = vmul.f32 %v1494_v56, %v3087_v15  ;;  %v1331_v58 = vadd.f32 %v1299_v16, %v1230_v53  ;;  %v1130_v54 = vadd.f32 %v1098_v22, %v1027_v27  ;;  %v1300_v40 = vmul.f32 %v2885_v7, %v3144_v46  ;;  %v1062_v27 = vld [vmem:[#allocation2 + $0x20f] sm:$0xff] }
  0xe0   : > { %v826_v61 = vadd.f32 %v794_v37, %v724_v8  ;;  %v895_v55 = vmul.f32 %v2812_v12, %v1161_v60  ;;  %v1665_v11 = vadd.f32 %v1633_v43, %v1557_v34  ;;  %v996_v15 = vmul.f32 %v2898_v62, %v3109_v21  ;;  %v1164_v37 = vld [vmem:[#allocation2 + $0x210] sm:$0xff] }
  0xe1   : > { %v1596_v17 = vmul.f32 %v3083_v6, %v1526_v57  ;;  %v3156_v4 = vadd.f32 %v2982_v23, %v1331_v58  ;;  %v1231_v30 = vadd.f32 %v1199_v45, %v1130_v54  ;;  %v491_v24 = vmul.f32 %v2772_v50, %v454_v32  ;;  %v456_v57 = vld [vmem:[#allocation2 + $0x1ef] sm:$0xff] }
  0xe2   : > { %v927_v18 = vadd.f32 %v895_v55, %v826_v61  ;;  %v592_v16 = vmul.f32 %v2778_v52, %v555_v39  ;;  %1697 = vst.msk [vmem:[%s2621_s8 + $0xb0] sm:$0xff] %vm315_vm0, %v1665_v11  ;;  %v1399_v19 = vmul.f32 0.5, %v3105_v1  ;;  %v1099_v20 = vmul.f32 %v2825_v3, %v1061_v47  ;;  %v557_v58 = vld [vmem:[#allocation2 + $0x1f0] sm:$0xff] }
  0xe3   : > { %v1634_v60 = vadd.f32 %v3097_v49, %v1596_v17  ;;  %v1433_v14 = vmul.f32 0.70710677, %v3156_v4  ;;  %v1332_v25 = vadd.f32 %v1300_v40, %v1231_v30  ;;  %v693_v63 = vmul.f32 %v2917_v41, %v3072_v10  ;;  %v1265_v55 = vld [vmem:[#allocation2 + $0x211] sm:$0xff]  ;;  %v1559_v17 = vld [vmem:[%s2106_s25 + $0xc0] sm:$0xff] }
  0xe4   : > { %v1028_v59 = vadd.f32 %v996_v15, %v927_v18  ;;  %v624_v44 = vadd.f32 %v592_v16, %v491_v24  ;;  %v1200_v1 = vmul.f32 %v2802_v28, %v1163_v13  ;;  %v795_v2 = vmul.f32 %v2794_v42, %v3126_v0 }
  0xe5   : > { %v1951_v51 = vpop.eup %1950  ;;  %v1666_v5 = vadd.f32 %v1634_v60, %v1558_v29  ;;  %1954 = verf.f32 %v1433_v14  ;;  %v3172_v38 = vadd.f32 %v2982_v23, %v1332_v25  ;;  %v1301_v56 = vmul.f32 %v2885_v7, %v1264_v9 }
  0xe6   : > { %v1495_v22 = vadd.f32 1.0, %v1951_v51  ;;  %v1131_v31 = vadd.f32 %v1099_v20, %v1028_v59  ;;  %v725_v26 = vadd.f32 %v693_v63, %v624_v44  ;;  %v896_v53 = vmul.f32 %v2812_v12, %v1162_v35  ;;  %v1063_v44 = vld [vmem:[#allocation2 + $0x227] sm:$0xff] }
  0xe7   : > { %1698 = vst.msk [vmem:[%s2621_s8 + $0xb8] sm:$0xff] %vm315_vm0, %v1666_v5  ;;  %v1434_v10 = vmul.f32 0.70710677, %v3172_v38  ;;  %v492_v32 = vmul.f32 %v2772_v50, %v455_v33  ;;  %v1400_v39 = vmul.f32 0.5, %v3129_v36  ;;  %v997_v0 = vmul.f32 %v2898_v62, %v3144_v46 }
  0xe8   : > { %v1527_v34 = vmul.f32 %v1495_v22, %v1399_v19  ;;  %v1232_v45 = vadd.f32 %v1200_v1, %v1131_v31  ;;  %v827_v8 = vadd.f32 %v795_v2, %v725_v26  ;;  %v593_v43 = vmul.f32 %v2778_v52, %v556_v48  ;;  %v1560_v48 = vld [vmem:[%s2106_s25 + $0xc8] sm:$0xff] }
  0xe9   : > { %1956 = verf.f32 %v1434_v10  ;;  %v1100_v61 = vmul.f32 %v2825_v3, %v1062_v27  ;;  %v1201_v30 = vmul.f32 %v2802_v28, %v1164_v37  ;;  %v694_v29 = vmul.f32 %v2917_v41, %v3109_v21 }
  0xea   : > { %v1597_v35 = vmul.f32 %v3083_v6, %v1527_v34  ;;  %v1333_v54 = vadd.f32 %v1301_v56, %v1232_v45  ;;  %v928_v40 = vadd.f32 %v896_v53, %v827_v8  ;;  %v625_v36 = vadd.f32 %v593_v43, %v492_v32 }
  0xeb   : > { %v1953_v11 = vpop.eup %1952  ;;  %v796_v18 = vmul.f32 %v2794_v42, %v1061_v47  ;;  %v1302_v19 = vmul.f32 %v2885_v7, %v1265_v55  ;;  %v493_v25 = vmul.f32 %v2772_v50, %v456_v57  ;;  %v594_v28 = vmul.f32 %v2778_v52, %v557_v58 }
  0xec   : > { %v1635_v15 = vadd.f32 %v3097_v49, %v1597_v35  ;;  %v1496_v24 = vadd.f32 1.0, %v1953_v11  ;;  %v3196_v16 = vadd.f32 %v2982_v23, %v1333_v54  ;;  %v1029_v60 = vadd.f32 %v997_v0, %v928_v40  ;;  %v1266_v0 = vld [vmem:[#allocation2 + $0x229] sm:$0xff] }
  0xed   : > { %v726_v14 = vadd.f32 %v694_v29, %v625_v36  ;;  %v897_v20 = vmul.f32 %v2812_v12, %v1163_v13  ;;  %v626_v33 = vadd.f32 %v594_v28, %v493_v25  ;;  %v695_v5 = vmul.f32 %v2917_v41, %v3144_v46  ;;  %v1166_v11 = vld [vmem:[#allocation2 + $0x230] sm:$0xff] }
  0xee   : > { %v1667_v59 = vadd.f32 %v1635_v15, %v1559_v17  ;;  %v1528_v21 = vmul.f32 %v1496_v24, %v1400_v39  ;;  %v1435_v47 = vmul.f32 0.70710677, %v3196_v16  ;;  %v1132_v63 = vadd.f32 %v1100_v61, %v1029_v60  ;;  %v1561_v17 = vld [vmem:[%s2106_s25 + $0xd0] sm:$0xff] }
  0xef   : > { %v828_v51 = vadd.f32 %v796_v18, %v726_v14  ;;  %v998_v52 = vmul.f32 %v2898_v62, %v1264_v9  ;;  %v797_v1 = vmul.f32 %v2794_v42, %v1062_v27  ;;  %v1101_v13 = vmul.f32 %v2825_v3, %v1063_v44  ;;  %v1165_v9 = vld [vmem:[#allocation2 + $0x228] sm:$0xff] }
  0xf0   : > { %1699 = vst.msk [vmem:[%s2621_s8 + $0xc0] sm:$0xff] %vm315_vm0, %v1667_v59  ;;  %v1598_v50 = vmul.f32 %v3083_v6, %v1528_v21  ;;  %1958 = verf.f32 %v1435_v47  ;;  %v1233_v22 = vadd.f32 %v1201_v30, %v1132_v63  ;;  %v727_v26 = vadd.f32 %v695_v5, %v626_v33  ;;  %v1064_v42 = vld [vmem:[#allocation2 + $0x22f] sm:$0xff] }
  0xf1   : > { %v929_v31 = vadd.f32 %v897_v20, %v828_v51  ;;  %v1401_v41 = vmul.f32 0.5, %v3156_v4  ;;  %v898_v46 = vmul.f32 %v2812_v12, %v1164_v37  ;;  %v1978_v12 = vld [vmem:[%s3269_s1 + $0x9] ss:$0 sm:$0xff]  ;;  %v999_v37 = vmul.f32 %v2898_v62, %v1265_v55  ;;  %v1267_v62 = vld [vmem:[#allocation2 + $0x231] sm:$0xff] }
  0xf2   : > { %v1955_v2 = vpop.eup %1954  ;;  %v1636_v10 = vadd.f32 %v3097_v49, %v1598_v50  ;;  %v1334_v53 = vadd.f32 %v1302_v19, %v1233_v22  ;;  %v829_v45 = vadd.f32 %v797_v1, %v727_v26  ;;  %v1202_v4 = vmul.f32 %v1978_v12, %v1165_v9  ;;  %v1562_v19 = vld [vmem:[%s2106_s25 + $0xd8] sm:$0xff]  ;;  %v1564_v26 = vld [vmem:[%s2106_s25 + $0xe8] sm:$0xff] }
  0xf3   : > { %v1497_v56 = vadd.f32 1.0, %v1955_v2  ;;  %v1030_v34 = vadd.f32 %v998_v52, %v929_v31  ;;  %v1102_v58 = vmul.f32 %v2825_v3, %v1064_v42  ;;  %v1402_v54 = vmul.f32 0.5, %v3172_v38  ;;  %v1563_v52 = vld [vmem:[%s2106_s25 + $0xe0] sm:$0xff] }
  0xf4   : > { %v1668_v27 = vadd.f32 %v1636_v10, %v1560_v48  ;;  %v1372_v32 = vadd.f32 %v2982_v23, %v1334_v53  ;;  %v930_v43 = vadd.f32 %v898_v46, %v829_v45  ;;  %v1303_v36 = vmul.f32 %v2885_v7, %v1266_v0 }
  0xf5   : > { %v1529_v8 = vmul.f32 %v1497_v56, %v1401_v41  ;;  %v1133_v39 = vadd.f32 %v1101_v13, %v1030_v34  ;;  %v1203_v24 = vmul.f32 %v1978_v12, %v1166_v11  ;;  %v1304_v28 = vmul.f32 %v2885_v7, %v1267_v62 }
  0xf6   : > { %v1957_v57 = vpop.eup %1956  ;;  %1700 = vst.msk [vmem:[%s2621_s8 + $0xc8] sm:$0xff] %vm315_vm0, %v1668_v27  ;;  %v1436_v61 = vmul.f32 0.70710677, %v1372_v32  ;;  %v1031_v29 = vadd.f32 %v999_v37, %v930_v43  ;;  %v1403_v47 = vmul.f32 0.5, %v3196_v16  ;;  %v1404_v22 = vmul.f32 0.5, %v1372_v32  ;;  %v1565_v27 = vld [vmem:[%s2106_s25 + $0xf0] sm:$0xff] }
  0xf7   : > { %v1599_v35 = vmul.f32 %v3083_v6, %v1529_v8  ;;  %v1498_v40 = vadd.f32 1.0, %v1957_v57  ;;  %v1234_v30 = vadd.f32 %v1202_v4, %v1133_v39  ;;  %v1566_v43 = vld [vmem:[%s2106_s25 + $0xf8] sm:$0xff] }
  0xf8   : > { %1960 = verf.f32 %v1436_v61  ;;  %v1134_v55 = vadd.f32 %v1102_v58, %v1031_v29 }
  0xf9   : > { %v1637_v18 = vadd.f32 %v3097_v49, %v1599_v35  ;;  %v1530_v15 = vmul.f32 %v1498_v40, %v1402_v54  ;;  %v1335_v3 = vadd.f32 %v1303_v36, %v1234_v30 }
  0xfa   : > { %v1235_v25 = vadd.f32 %v1203_v24, %v1134_v55 }
  0xfb   : > { %v1669_v60 = vadd.f32 %v1637_v18, %v1561_v17  ;;  %v1600_v38 = vmul.f32 %v3083_v6, %v1530_v15  ;;  %v1373_v14 = vadd.f32 %v2982_v23, %v1335_v3 }
  0xfc   : > { %v1336_v63 = vadd.f32 %v1304_v28, %v1235_v25 }
  0xfd   : > { %v1959_v59 = vpop.eup %1958  ;;  %1701 = vst.msk [vmem:[%s2621_s8 + $0xd0] sm:$0xff] %vm315_vm0, %v1669_v60  ;;  %v1638_v21 = vadd.f32 %v3097_v49, %v1600_v38  ;;  %v1437_v44 = vmul.f32 0.70710677, %v1373_v14  ;;  %v1405_v41 = vmul.f32 0.5, %v1373_v14 }
  0xfe   : > { %v1499_v20 = vadd.f32 1.0, %v1959_v59  ;;  %v1374_v5 = vadd.f32 %v2982_v23, %v1336_v63 }
  0xff   : > { %v1670_v51 = vadd.f32 %v1638_v21, %v1562_v19  ;;  %1962 = verf.f32 %v1437_v44 }
 0x100   : > { %v1531_v33 = vmul.f32 %v1499_v20, %v1403_v47  ;;  %v1438_v50 = vmul.f32 0.70710677, %v1374_v5  ;;  %v1406_v45 = vmul.f32 0.5, %v1374_v5 }
 0x101   : > { %1702 = vst.msk [vmem:[%s2621_s8 + $0xd8] sm:$0xff] %vm315_vm0, %v1670_v51 }
 0x102   : > { %v1601_v7 = vmul.f32 %v3083_v6, %v1531_v33  ;;  %1964 = verf.f32 %v1438_v50 }
 0x104   : > { %v1639_v1 = vadd.f32 %v3097_v49, %v1601_v7 }
 0x105   : > { %v1961_v16 = vpop.eup %1960 }
 0x106   : > { %v1671_v48 = vadd.f32 %v1639_v1, %v1563_v52  ;;  %v1500_v31 = vadd.f32 1.0, %v1961_v16 }
 0x108   : > { %1703 = vst.msk [vmem:[%s2621_s8 + $0xe0] sm:$0xff] %vm315_vm0, %v1671_v48  ;;  %v1532_v13 = vmul.f32 %v1500_v31, %v1404_v22 }
 0x10a   : > { %v1602_v23 = vmul.f32 %v3083_v6, %v1532_v13 }
 0x10c   : > { %v1963_v2 = vpop.eup %1962  ;;  %v1640_v10 = vadd.f32 %v3097_v49, %v1602_v23 }
 0x10d   : > { %v1501_v46 = vadd.f32 1.0, %v1963_v2 }
 0x10e   : > { %v1672_v56 = vadd.f32 %v1640_v10, %v1564_v26 }
 0x10f   : > { %v1533_v53 = vmul.f32 %v1501_v46, %v1405_v41  ;;  %v1965_v34 = vpop.eup %1964 }
 0x110   : > { %1704 = vst.msk [vmem:[%s2621_s8 + $0xe8] sm:$0xff] %vm315_vm0, %v1672_v56  ;;  %v1502_v42 = vadd.f32 1.0, %v1965_v34 }
 0x111   : > { %v1603_v9 = vmul.f32 %v3083_v6, %v1533_v53 }
 0x112   : > { %v1534_v32 = vmul.f32 %v1502_v42, %v1406_v45 }
 0x113   : > { %v1641_v8 = vadd.f32 %v3097_v49, %v1603_v9 }
 0x114   : > { %v1604_v0 = vmul.f32 %v3083_v6, %v1534_v32 }
 0x115   : > { %v1673_v39 = vadd.f32 %v1641_v8, %v1565_v27 }
 0x116   : > { %v1642_v57 = vadd.f32 %v3097_v49, %v1604_v0 }
 0x117   : > { %1705 = vst.msk [vmem:[%s2621_s8 + $0xf0] sm:$0xff] %vm315_vm0, %v1673_v39 }
 0x118   : > { %v1674_v12 = vadd.f32 %v1642_v57, %v1566_v43 }
 0x11a   : > { %1706 = vst.msk [vmem:[%s2621_s8 + $0xf8] sm:$0xff] %vm315_vm0, %v1674_v12 }
 0x11b PF: > { %s15_s20 = sadd.s32 1, %s2001_s20   ;;  %s3375_s18 = smov %s1997_s19 }
 0x11c   : > { %p12_p5 = scmp.ge.s32.totalorder %s15_s20, 4   ;;  %s3376_s19 = smov %s3378_s21 }
 0x11e   :  { %14 = sbr.rel (!%p12_p5) target bundleno = 2 (0x2), region = 87 }

</bundles_post_ra>
